<compile_context>
chip_gen: v7x
topology: tpu7x:2x2x1
jax: 0.10.0
libtpu: 0.0.40
codegen_flags: <defaults>
</compile_context>

<pallas_src>
import jax
import jax.numpy as jnp
from jax.experimental import pallas as pl
from jax.experimental.pallas import tpu as pltpu

BN_EPS = 1e-3


def _se_conv_bn_kernel(xse_ref, w1t_ref, b1_ref, x_ref, w2_ref, gb_ref, o_ref):
    # xse_ref : [8, C_se]        f32   (x388 row, replicated to 8 sublanes)
    # w1t_ref : [C_se, C_mid]    bf16  (conv2d122 weight, transposed)
    # b1_ref  : [1, C_mid]       f32   (row, not a padded column)
    # x_ref   : [C_mid, HW]      f32   (x385, native NCHW flatten)
    # w2_ref  : [TCO, C_mid]     bf16  (this grid step's rows of conv2d123 weight)
    # gb_ref  : [TCO, 2]         f32   (lane 0 = gamma, lane 1 = beta)
    # o_ref   : [TCO, HW]        f32

    # --- SE gate as a lane-dense row: one tiny bf16 MXU matmul + EUP sigmoid ---
    xse8 = xse_ref[...].astype(jnp.bfloat16)                       # [8, C_se]
    g8 = jnp.dot(xse8, w1t_ref[...],
                 preferred_element_type=jnp.float32)               # [8, C_mid] (rows identical)
    g = jax.nn.sigmoid(g8[0:1, :] + b1_ref[...])                   # [1, C_mid] f32
    g = g.astype(jnp.bfloat16)                                     # rounded once for the fold

    # --- Fold the gate into w2's columns (lane-aligned bf16 broadcast) --------
    # y = conv2(x * g_col) == (w2 * g_row) @ x, so no column relayout and no
    # f32 materialization of w2 is ever needed.
    w2s = w2_ref[...] * g                                          # [TCO, C_mid] bf16

    # --- conv2d123 (1x1, no bias): native bf16 MXU matmul, f32 accumulate -----
    xb = x_ref[...].astype(jnp.bfloat16)                           # [C_mid, HW] bf16
    y = jnp.dot(w2s, xb, preferred_element_type=jnp.float32)       # [TCO, HW] f32

    # --- BatchNorm2d (training mode: biased batch stats over N*H*W) -----------
    mean = jnp.mean(y, axis=1, keepdims=True)                      # [TCO, 1]
    var = jnp.mean(jnp.square(y - mean), axis=1, keepdims=True)    # [TCO, 1]
    inv = jax.lax.rsqrt(var + BN_EPS)
    scale = gb_ref[:, 0:1] * inv                                   # gamma * inv
    shift = gb_ref[:, 1:2] - mean * scale                          # beta - mean*scale
    o_ref[...] = y * scale + shift                                 # fused affine: 2 passes


def prepack_params(w1, b1, w2, gamma, beta):
    """One-time parameter layout/cast (hoisted out of the per-call path).

    w1: [C_mid, C_se, 1, 1], b1: [C_mid], w2: [C_out, C_mid, 1, 1],
    gamma/beta: [C_out]  (PyTorch-native shapes).
    """
    c_mid, c_se = w1.shape[0], w1.shape[1]
    c_out = w2.shape[0]
    return {
        # conv2d122 weight transposed -> the SE gate comes out as a lane-dense
        # [1, C_mid] row from a single MXU matmul.
        "w1t": jnp.asarray(w1).reshape(c_mid, c_se).T.astype(jnp.bfloat16),
        "b1": jnp.asarray(b1).reshape(1, c_mid).astype(jnp.float32),
        # conv2d123 weight in native [C_out, C_mid] layout, bf16 storage (HBM/VMEM halved).
        "w2": jnp.asarray(w2).reshape(c_out, c_mid).astype(jnp.bfloat16),
        # gamma/beta stacked as two lanes of one contiguous [C_out, 2] array:
        # one small DMA instead of two padded [C_out, 1] column transfers.
        "gb": jnp.stack([jnp.asarray(gamma).reshape(c_out),
                         jnp.asarray(beta).reshape(c_out)], axis=1).astype(jnp.float32),
    }


@jax.jit
def se_conv_bn(x388, x385, params):
    """Forward pass of module M.

    x388: [1, C_se, 1, 1] NCHW, x385: [1, C_mid, H, W] NCHW,
    params: output of prepack_params().  Returns [1, C_out, H, W] float32.
    """
    n, c_se = x388.shape[0], x388.shape[1]
    _, c_mid, h, w = x385.shape
    c_out = params["w2"].shape[0]
    hw = h * w

    # Native NCHW layouts -> pure reshapes (no transposes, no big casts).
    xse = jnp.broadcast_to(x388.reshape(1, c_se).astype(jnp.float32), (8, c_se))
    x_flat = x385.reshape(c_mid, hw).astype(jnp.float32)            # [C_mid, HW]

    # Grid over C_out: pipelines the second w2 half's DMA under step-0 compute
    # and lets v7x's two TensorCores split conv2 + BN (BN stats are per-channel,
    # so the blocks are independent).  No-op cost on single-core chips.
    n_blocks = 2
    tco = c_out // n_blocks

    grid_spec = pltpu.PrefetchScalarGridSpec(
        num_scalar_prefetch=0,
        grid=(n_blocks,),
        in_specs=[
            pl.BlockSpec((8, c_se), lambda i: (0, 0)),          # xse  (grid-invariant)
            pl.BlockSpec((c_se, c_mid), lambda i: (0, 0)),      # w1t  (grid-invariant)
            pl.BlockSpec((1, c_mid), lambda i: (0, 0)),         # b1   (grid-invariant)
            pl.BlockSpec((c_mid, hw), lambda i: (0, 0)),        # x    (grid-invariant)
            pl.BlockSpec((tco, c_mid), lambda i: (i, 0)),       # w2 block
            pl.BlockSpec((tco, 2), lambda i: (i, 0)),           # gamma/beta block
        ],
        out_specs=pl.BlockSpec((tco, hw), lambda i: (i, 0)),
    )

    flops = (2 * hw * c_mid * c_out        # conv2 matmul
             + 2 * 8 * c_se * c_mid        # SE gate matmul
             + c_mid * c_out               # gate fold
             + 6 * c_out * hw)             # BN
    bytes_accessed = (xse.size * 4 + x_flat.size * 4 + c_out * hw * 4
                      + params["w1t"].size * 2 + params["w2"].size * 2
                      + params["b1"].size * 4 + params["gb"].size * 4)

    out = pl.pallas_call(
        _se_conv_bn_kernel,
        out_shape=jax.ShapeDtypeStruct((c_out, hw), jnp.float32),
        grid_spec=grid_spec,
        compiler_params=pltpu.CompilerParams(dimension_semantics=("parallel",)),
        cost_estimate=pl.CostEstimate(flops=flops, transcendentals=c_mid + c_out,
                                      bytes_accessed=bytes_accessed),
    )(xse, params["w1t"], params["b1"], x_flat, params["w2"], params["gb"])

    return out.reshape(n, c_out, h, w)                              # free reshape to NCHW


def reference(x388, x385, params, eps=BN_EPS):
    """Pure-JAX reference mirroring the kernel's bf16 storage/rounding steps so
    the Pallas arithmetic is validated at tight tolerance."""
    hp = jax.lax.Precision.HIGHEST
    w1t = params["w1t"].astype(jnp.float32)                         # [C_se, C_mid]
    b1 = params["b1"]                                               # [1, C_mid]
    w2 = params["w2"].astype(jnp.float32)                           # [C_out, C_mid]
    gamma = params["gb"][:, 0:1]                                    # [C_out, 1]
    beta = params["gb"][:, 1:2]
    n, c_se = x388.shape[0], x388.shape[1]
    _, c_mid, h, w = x385.shape
    c_out = w2.shape[0]

    xse = x388.reshape(1, c_se).astype(jnp.bfloat16).astype(jnp.float32)
    g = jax.nn.sigmoid(jnp.dot(xse, w1t, precision=hp) + b1)        # [1, C_mid]
    g = g.astype(jnp.bfloat16).astype(jnp.float32)
    w2s = (w2 * g).astype(jnp.bfloat16).astype(jnp.float32)         # gate folded into w2
    xb = x385.reshape(c_mid, h * w).astype(jnp.bfloat16).astype(jnp.float32)
    y = jnp.dot(w2s, xb, precision=hp)                              # [C_out, HW]
    mean = jnp.mean(y, axis=1, keepdims=True)
    var = jnp.mean(jnp.square(y - mean), axis=1, keepdims=True)
    inv = jax.lax.rsqrt(var + eps)
    scale = gamma * inv
    shift = beta - mean * scale
    return (y * scale + shift).reshape(n, c_out, h, w)


if __name__ == "__main__":
    # Shapes implied by the module's forward pass (channel counts are fixed by
    # the conv definitions; spatial 7x7, batch 1).
    N, C_SE, C_MID, C_OUT, H, W = 1, 64, 1536, 256, 7, 7

    key = jax.random.PRNGKey(0)
    k_x388, k_x385, k_w1, k_b1, k_w2 = jax.random.split(key, 5)

    x388 = jax.random.normal(k_x388, (N, C_SE, 1, 1), dtype=jnp.float32)
    x385 = jax.random.normal(k_x385, (N, C_MID, H, W), dtype=jnp.float32)

    # Deterministic parameter initialization (shapes from __init__).
    w1 = jax.random.normal(k_w1, (C_MID, C_SE, 1, 1), dtype=jnp.float32) * (1.0 / C_SE) ** 0.5
    b1 = jax.random.normal(k_b1, (C_MID,), dtype=jnp.float32) * 0.01
    w2 = jax.random.normal(k_w2, (C_OUT, C_MID, 1, 1), dtype=jnp.float32) * (1.0 / C_MID) ** 0.5
    gamma = jnp.ones((C_OUT,), dtype=jnp.float32)   # BatchNorm2d affine weight default
    beta = jnp.zeros((C_OUT,), dtype=jnp.float32)   # BatchNorm2d affine bias default

    # One-time weight layout / bf16 cast (hoisted out of the per-call path).
    params = prepack_params(w1, b1, w2, gamma, beta)

    out = jax.block_until_ready(se_conv_bn(x388, x385, params))
    ref = jax.block_until_ready(reference(x388, x385, params))

    assert out.shape == (N, C_OUT, H, W), out.shape
    max_err = float(jnp.max(jnp.abs(out - ref)))
    assert jnp.allclose(out, ref, atol=2e-3, rtol=2e-3), max_err
    print("KERNEL_OK")
</pallas_src>

<mosaic_0001>
module attributes {stable_mosaic.version = 11 : i64} {
  func.func @_se_conv_bn_kernel(%arg0: i32, %arg1: memref<8x64xf32, #tpu.memory_space<vmem>>, %arg2: memref<64x1536xbf16, #tpu.memory_space<vmem>>, %arg3: memref<1x1536xf32, #tpu.memory_space<vmem>>, %arg4: memref<1536x49xf32, #tpu.memory_space<vmem>>, %arg5: memref<128x1536xbf16, #tpu.memory_space<vmem>>, %arg6: memref<128x2xf32, #tpu.memory_space<vmem>>, %arg7: memref<128x49xf32, #tpu.memory_space<vmem>>) attributes {dimension_semantics = [#tpu.dimension_semantics<parallel>], iteration_bounds = array<i64: 2>, scalar_prefetch = 0 : i64, scratch_operands = 0 : i64, tpu.core_type = #tpu.core_type<tc>, window_params = [{pipeline_mode = #tpu.pipeline_mode<synchronous>, transform_indices = @transform_0, window_bounds = array<i64: 8, 64>}, {pipeline_mode = #tpu.pipeline_mode<synchronous>, transform_indices = @transform_1, window_bounds = array<i64: 64, 1536>}, {pipeline_mode = #tpu.pipeline_mode<synchronous>, transform_indices = @transform_2, window_bounds = array<i64: 1, 1536>}, {pipeline_mode = #tpu.pipeline_mode<synchronous>, transform_indices = @transform_3, window_bounds = array<i64: 1536, 49>}, {transform_indices = @transform_4, window_bounds = array<i64: 128, 1536>}, {transform_indices = @transform_5, window_bounds = array<i64: 128, 2>}, {transform_indices = @transform_6, window_bounds = array<i64: 128, 49>}]} {
    %c0 = arith.constant 0 : index
    %c0_0 = arith.constant 0 : index
    %0 = vector.load %arg1[%c0, %c0_0] : memref<8x64xf32, #tpu.memory_space<vmem>>, vector<8x64xf32>
    %1 = arith.truncf %0 : vector<8x64xf32> to vector<8x64xbf16>
    %c0_1 = arith.constant 0 : index
    %c0_2 = arith.constant 0 : index
    %2 = vector.load %arg2[%c0_1, %c0_2] : memref<64x1536xbf16, #tpu.memory_space<vmem>>, vector<64x1536xbf16>
    %cst = arith.constant dense<0.000000e+00> : vector<8x1536xf32>
    %3 = tpu.matmul %1, %2, %cst {dimension_numbers = #tpu.dot_dimension_numbers<[1], [0], [0], [1], [0, 0, 1, 1], [], []>} : vector<8x64xbf16>, vector<64x1536xbf16>, vector<8x1536xf32> -> vector<8x1536xf32>
    %4 = vector.extract_strided_slice %3 {offsets = [0, 0], sizes = [1, 1536], strides = [1, 1]} : vector<8x1536xf32> to vector<1x1536xf32>
    %c0_3 = arith.constant 0 : index
    %c0_4 = arith.constant 0 : index
    %5 = vector.load %arg3[%c0_3, %c0_4] : memref<1x1536xf32, #tpu.memory_space<vmem>>, vector<1x1536xf32>
    %6 = arith.addf %4, %5 : vector<1x1536xf32>
    %7 = arith.negf %6 : vector<1x1536xf32>
    %8 = math.exp %7 : vector<1x1536xf32>
    %cst_5 = arith.constant 1.000000e+00 : f32
    %9 = vector.broadcast %cst_5 : f32 to vector<1x1536xf32>
    %10 = arith.addf %9, %8 : vector<1x1536xf32>
    %11 = arith.divf %9, %10 : vector<1x1536xf32>
    %12 = arith.truncf %11 : vector<1x1536xf32> to vector<1x1536xbf16>
    %c0_6 = arith.constant 0 : index
    %c0_7 = arith.constant 0 : index
    %13 = vector.load %arg5[%c0_6, %c0_7] : memref<128x1536xbf16, #tpu.memory_space<vmem>>, vector<128x1536xbf16>
    %14 = vector.broadcast %12 : vector<1x1536xbf16> to vector<128x1536xbf16>
    %15 = arith.mulf %13, %14 : vector<128x1536xbf16>
    %c0_8 = arith.constant 0 : index
    %c0_9 = arith.constant 0 : index
    %16 = vector.load %arg4[%c0_8, %c0_9] : memref<1536x49xf32, #tpu.memory_space<vmem>>, vector<1536x49xf32>
    %17 = arith.truncf %16 : vector<1536x49xf32> to vector<1536x49xbf16>
    %cst_10 = arith.constant dense<0.000000e+00> : vector<128x49xf32>
    %18 = tpu.matmul %15, %17, %cst_10 {dimension_numbers = #tpu.dot_dimension_numbers<[1], [0], [0], [1], [0, 0, 1, 1], [], []>} : vector<128x1536xbf16>, vector<1536x49xbf16>, vector<128x49xf32> -> vector<128x49xf32>
    %cst_11 = arith.constant dense<0.000000e+00> : vector<128xf32>
    %19 = vector.multi_reduction <add>, %18, %cst_11 [1] : vector<128x49xf32> to vector<128xf32>
    %20 = vector.shape_cast %19 : vector<128xf32> to vector<128x1xf32>
    %cst_12 = arith.constant 4.900000e+01 : f32
    %21 = vector.broadcast %cst_12 : f32 to vector<128x1xf32>
    %22 = arith.divf %20, %21 : vector<128x1xf32>
    %23 = vector.broadcast %22 : vector<128x1xf32> to vector<128x49xf32>
    %24 = arith.subf %18, %23 : vector<128x49xf32>
    %25 = arith.mulf %24, %24 : vector<128x49xf32>
    %cst_13 = arith.constant dense<0.000000e+00> : vector<128xf32>
    %26 = vector.multi_reduction <add>, %25, %cst_13 [1] : vector<128x49xf32> to vector<128xf32>
    %27 = vector.shape_cast %26 : vector<128xf32> to vector<128x1xf32>
    %cst_14 = arith.constant 4.900000e+01 : f32
    %28 = vector.broadcast %cst_14 : f32 to vector<128x1xf32>
    %29 = arith.divf %27, %28 : vector<128x1xf32>
    %cst_15 = arith.constant 1.000000e-03 : f32
    %30 = vector.broadcast %cst_15 : f32 to vector<128x1xf32>
    %31 = arith.addf %29, %30 : vector<128x1xf32>
    %32 = math.rsqrt %31 : vector<128x1xf32>
    %c0_16 = arith.constant 0 : index
    %c0_17 = arith.constant 0 : index
    %33 = vector.load %arg6[%c0_16, %c0_17] : memref<128x2xf32, #tpu.memory_space<vmem>>, vector<128x1xf32>
    %34 = arith.mulf %33, %32 : vector<128x1xf32>
    %c0_18 = arith.constant 0 : index
    %c1 = arith.constant 1 : index
    %35 = vector.load %arg6[%c0_18, %c1] : memref<128x2xf32, #tpu.memory_space<vmem>>, vector<128x1xf32>
    %36 = arith.mulf %22, %34 : vector<128x1xf32>
    %37 = arith.subf %35, %36 : vector<128x1xf32>
    %38 = vector.broadcast %34 : vector<128x1xf32> to vector<128x49xf32>
    %39 = arith.mulf %18, %38 : vector<128x49xf32>
    %40 = vector.broadcast %37 : vector<128x1xf32> to vector<128x49xf32>
    %41 = arith.addf %39, %40 : vector<128x49xf32>
    %c0_19 = arith.constant 0 : index
    %c0_20 = arith.constant 0 : index
    %42 = vector.load %arg7[%c0_19, %c0_20] : memref<128x49xf32, #tpu.memory_space<vmem>>, vector<128x49xf32>
    tpu.vector_store %arg7[%c0_19, %c0_20], %41 {strides = array<i32>} : memref<128x49xf32, #tpu.memory_space<vmem>>, vector<128x49xf32>,
    return
  }
  func.func @transform_0(%arg0: i32) -> (i32, i32) {
    %c0_i32 = arith.constant 0 : i32
    %c0_i32_0 = arith.constant 0 : i32
    %c0_i32_1 = arith.constant 0 : i32
    return %c0_i32, %c0_i32_0 : i32, i32
  }
  func.func @transform_1(%arg0: i32) -> (i32, i32) {
    %c0_i32 = arith.constant 0 : i32
    %c0_i32_0 = arith.constant 0 : i32
    %c0_i32_1 = arith.constant 0 : i32
    return %c0_i32, %c0_i32_0 : i32, i32
  }
  func.func @transform_2(%arg0: i32) -> (i32, i32) {
    %c0_i32 = arith.constant 0 : i32
    %c0_i32_0 = arith.constant 0 : i32
    %c0_i32_1 = arith.constant 0 : i32
    return %c0_i32, %c0_i32_0 : i32, i32
  }
  func.func @transform_3(%arg0: i32) -> (i32, i32) {
    %c0_i32 = arith.constant 0 : i32
    %c0_i32_0 = arith.constant 0 : i32
    %c0_i32_1 = arith.constant 0 : i32
    return %c0_i32, %c0_i32_0 : i32, i32
  }
  func.func @transform_4(%arg0: i32) -> (i32, i32) {
    %c0_i32 = arith.constant 0 : i32
    %c0_i32_0 = arith.constant 0 : i32
    return %arg0, %c0_i32 : i32, i32
  }
  func.func @transform_5(%arg0: i32) -> (i32, i32) {
    %c0_i32 = arith.constant 0 : i32
    %c0_i32_0 = arith.constant 0 : i32
    return %arg0, %c0_i32 : i32, i32
  }
  func.func @transform_6(%arg0: i32) -> (i32, i32) {
    %c0_i32 = arith.constant 0 : i32
    %c0_i32_0 = arith.constant 0 : i32
    return %arg0, %c0_i32 : i32, i32
  }
}

</mosaic_0001>

<bundles_post_ra>
// kernel: se_conv_bn.1
= control target key start
LH: loop header
LB: loop body
LE: loop exit
PB: predicated region body
PF: predicated region fallthrough
CT: control target
= control target key end

     0   :  { %s4020_s21 = smov 0   ;;  %s5665_s0 = inlined_call_operand.vmem [shape: f32[8,64], index: 0, kind: input, shape index: {}]   ;;  %s5666_s1 = inlined_call_operand.vmem [shape: bf16[64,1536], index: 1, kind: input, shape index: {}]   ;;  %s5667_s2 = inlined_call_operand.vmem [shape: f32[1,1536], index: 2, kind: input, shape index: {}]   ;;  %s5668_s3 = inlined_call_operand.vmem [shape: f32[1536,49], index: 3, kind: input, shape index: {}]   ;;  %s5669_s4 = inlined_call_operand.vmem [shape: bf16[256,1536], index: 4, kind: input, shape index: {}]   ;;  %s5670_s5 = inlined_call_operand.vmem [shape: f32[256,2], index: 5, kind: input, shape index: {}]   ;;  %s5671_s6 = inlined_call_operand.vmem [shape: f32[256,49], index: 6, kind: output, shape index: {}]  }
   0x1 LB: > { %s3241_s22 = sadd.s32 4294967295, %s3980_s21   ;;  %p3245_p0 = scmp.ge.s32.totalorder %s3980_s21, 1  ;;  %s3980_s21 = sphi %s4020_s21, %s16_s21  }
   0x2   : > { %p225_p1 = scmp.lt.s32.totalorder %s3980_s21, 3 }
   0x4   : > { %p226_p2 = pnand %p3245_p0, %p225_p1 }
   0x5   : > { %v3822_v0 = vld [vmem:[%s5666_s1 + $0x4] ss:$48 sps:$4 sm:$0xff] (!%p226_p2)   ;;  %v3824_v1 = vld [vmem:[%s5666_s1 + $0xc] ss:$48 sps:$4 sm:$0xff] (!%p226_p2)   ;;  %v3982_v2 = vmov (!%p226_p2), 0   ;;  %vm571_vm0 = vcmask (!%p226_p2), 523264  }
   0x6   : > { %229 = sbr.rel (%p226_p2) target bundleno = 1244 (0x4dc), region = 44  ;;  %607 = vmatprep.mubr.bf16.mxu0 (!%p226_p2), %v3982_v2  ;;  %648 = vmatprep.mubr.bf16.mxu1 (!%p226_p2), %v3982_v2  ;;  %v3826_v3 = vld [vmem:[%s5666_s1] ss:$48 sps:$4 sm:$0xff] (!%p226_p2)   ;;  %v3827_v4 = vld [vmem:[%s5666_s1 + $0x8] ss:$48 sps:$4 sm:$0xff] (!%p226_p2)   ;;  %s3246_s15 = sshll.u32 (!%p226_p2), %s3241_s22, 4 }
   0x7   : > { %575 = vmatprep.subr.bf16.mxu0 (!%p226_p2), %v3822_v0  ;;  %3818 = vset.pattern.permute.xlu0 (!%p226_p2), %v3982_v2  ;;  %v3828_v5 = vld [vmem:[%s5666_s1 + $0x64] ss:$48 sps:$4 sm:$0xff] (!%p226_p2)   ;;  %v3830_v6 = vld [vmem:[%s5666_s1 + $0x6c] ss:$48 sps:$4 sm:$0xff] (!%p226_p2)   ;;  %v3832_v7 = vld [vmem:[%s5666_s1 + $0x60] ss:$48 sps:$4 sm:$0xff] (!%p226_p2)  }
   0x8   : > { %616 = vmatprep.subr.bf16.mxu1 (!%p226_p2), %v3824_v1  ;;  %3819 = vset.pattern.permute.xlu1 (!%p226_p2), %v3982_v2  ;;  %v3833_v8 = vld [vmem:[%s5666_s1 + $0x68] ss:$48 sps:$4 sm:$0xff] (!%p226_p2)   ;;  %v3834_v9 = vld [vmem:[%s5666_s1 + $0xc4] ss:$48 sps:$4 sm:$0xff] (!%p226_p2)   ;;  %v3836_v10 = vld [vmem:[%s5666_s1 + $0xcc] ss:$48 sps:$4 sm:$0xff] (!%p226_p2)  }
   0x9   : > { %576 = vmatpush1.bf16.msra.mxu0 (!%p226_p2), %v3826_v3  ;;  %617 = vmatpush1.bf16.msra.mxu1 (!%p226_p2), %v3827_v4  ;;  %v3838_v11 = vld [vmem:[%s5666_s1 + $0xc0] ss:$48 sps:$4 sm:$0xff] (!%p226_p2)   ;;  %v3839_v12 = vld [vmem:[%s5666_s1 + $0xc8] ss:$48 sps:$4 sm:$0xff] (!%p226_p2)   ;;  %v3840_v13 = vld [vmem:[%s5666_s1 + $0x124] ss:$48 sps:$4 sm:$0xff] (!%p226_p2)  }
   0xa   : > { %577 = vmatprep.subr.bf16.mxu0 (!%p226_p2), %v3828_v5  ;;  %618 = vmatprep.subr.bf16.mxu1 (!%p226_p2), %v3830_v6  ;;  %v3842_v14 = vld [vmem:[%s5666_s1 + $0x12c] ss:$48 sps:$4 sm:$0xff] (!%p226_p2)   ;;  %v3844_v15 = vld [vmem:[%s5666_s1 + $0x120] ss:$48 sps:$4 sm:$0xff] (!%p226_p2)   ;;  %v3845_v16 = vld [vmem:[%s5666_s1 + $0x128] ss:$48 sps:$4 sm:$0xff] (!%p226_p2)  }
   0xb   : > { %v281_v17 = vld [vmem:[%s5665_s0] sm:$0xff] (!%p226_p2)  ;;  %v3851_v19 = vld [vmem:[%s5666_s1 + $0x1c] ss:$48 sps:$4 sm:$0xff] (!%p226_p2)   ;;  %v3849_v22 = vld [vmem:[%s5666_s1 + $0x18] ss:$48 sps:$4 sm:$0xff] (!%p226_p2)   ;;  %p262_p3 = scmp.lt.s32.totalorder (!%p226_p2), %s3246_s15, 31 }
   0xc   : > { %v3848_v18 = vld [vmem:[%s5666_s1 + $0x14] ss:$48 sps:$4 sm:$0xff] (!%p226_p2)   ;;  %v4089_v20 = vpack.c.bf16 (!%p226_p2), %v281_v17, %v281_v17  ;;  %v3846_v21 = vld [vmem:[%s5666_s1 + $0x10] ss:$48 sps:$4 sm:$0xff] (!%p226_p2)   ;;  %v3857_v24 = vld [vmem:[%s5666_s1 + $0x7c] ss:$48 sps:$4 sm:$0xff] (!%p226_p2)  }
   0xd   : > { %578 = vmatpush1.bf16.msra.mxu0 %v3832_v7  ;;  %619 = vmatpush1.bf16.msra.mxu1 %v3833_v8  ;;  %v3854_v23 = vld [vmem:[%s5666_s1 + $0x74] ss:$48 sps:$4 sm:$0xff]   ;;  %v3852_v25 = vld [vmem:[%s5666_s1 + $0x70] ss:$48 sps:$4 sm:$0xff]   ;;  %v3855_v26 = vld [vmem:[%s5666_s1 + $0x78] ss:$48 sps:$4 sm:$0xff]  }
   0xe   : > { %579 = vmatprep.subr.bf16.mxu0 %v3834_v9  ;;  %620 = vmatprep.subr.bf16.mxu1 %v3836_v10  ;;  %v3860_v27 = vld [vmem:[%s5666_s1 + $0xd4] ss:$48 sps:$4 sm:$0xff]   ;;  %v3863_v28 = vld [vmem:[%s5666_s1 + $0xdc] ss:$48 sps:$4 sm:$0xff]   ;;  %v3858_v29 = vld [vmem:[%s5666_s1 + $0xd0] ss:$48 sps:$4 sm:$0xff]  }
   0xf   : > { %v3861_v30 = vld [vmem:[%s5666_s1 + $0xd8] ss:$48 sps:$4 sm:$0xff]   ;;  %v3866_v31 = vld [vmem:[%s5666_s1 + $0x134] ss:$48 sps:$4 sm:$0xff]   ;;  %v3869_v32 = vld [vmem:[%s5666_s1 + $0x13c] ss:$48 sps:$4 sm:$0xff]  }
  0x10   : > { %v3864_v33 = vld [vmem:[%s5666_s1 + $0x130] ss:$48 sps:$4 sm:$0xff]   ;;  %v3867_v34 = vld [vmem:[%s5666_s1 + $0x138] ss:$48 sps:$4 sm:$0xff]   ;;  %v3872_v35 = vld [vmem:[%s5666_s1 + $0x24] ss:$48 sps:$4 sm:$0xff]  }
  0x11   : > { %580 = vmatpush1.bf16.msra.mxu0 %v3838_v11  ;;  %621 = vmatpush1.bf16.msra.mxu1 %v3839_v12  ;;  %v3875_v36 = vld [vmem:[%s5666_s1 + $0x2c] ss:$48 sps:$4 sm:$0xff]   ;;  %v3870_v37 = vld [vmem:[%s5666_s1 + $0x20] ss:$48 sps:$4 sm:$0xff]   ;;  %v3873_v38 = vld [vmem:[%s5666_s1 + $0x28] ss:$48 sps:$4 sm:$0xff]  }
  0x12   : > { %581 = vmatprep.subr.bf16.mxu0 %v3840_v13  ;;  %622 = vmatprep.subr.bf16.mxu1 %v3842_v14  ;;  %v3878_v39 = vld [vmem:[%s5666_s1 + $0x84] ss:$48 sps:$4 sm:$0xff]   ;;  %v3881_v40 = vld [vmem:[%s5666_s1 + $0x8c] ss:$48 sps:$4 sm:$0xff]   ;;  %v3876_v41 = vld [vmem:[%s5666_s1 + $0x80] ss:$48 sps:$4 sm:$0xff]  }
  0x13   : > { %v3879_v42 = vld [vmem:[%s5666_s1 + $0x88] ss:$48 sps:$4 sm:$0xff]   ;;  %v3884_v43 = vld [vmem:[%s5666_s1 + $0xe4] ss:$48 sps:$4 sm:$0xff]   ;;  %v3887_v44 = vld [vmem:[%s5666_s1 + $0xec] ss:$48 sps:$4 sm:$0xff]  }
  0x14   : > { %v3882_v45 = vld [vmem:[%s5666_s1 + $0xe0] ss:$48 sps:$4 sm:$0xff]   ;;  %v3885_v46 = vld [vmem:[%s5666_s1 + $0xe8] ss:$48 sps:$4 sm:$0xff]   ;;  %v3890_v47 = vld [vmem:[%s5666_s1 + $0x144] ss:$48 sps:$4 sm:$0xff]  }
  0x15   : > { %582 = vmatpush1.bf16.msra.mxu0 %v3844_v15  ;;  %623 = vmatpush1.bf16.msra.mxu1 %v3845_v16  ;;  %v3893_v48 = vld [vmem:[%s5666_s1 + $0x14c] ss:$48 sps:$4 sm:$0xff]   ;;  %v3888_v49 = vld [vmem:[%s5666_s1 + $0x140] ss:$48 sps:$4 sm:$0xff]   ;;  %v3891_v50 = vld [vmem:[%s5666_s1 + $0x148] ss:$48 sps:$4 sm:$0xff]  }
  0x16   : > { %657 = vmatprep.subr.bf16.mxu0 %v3848_v18  ;;  %698 = vmatprep.subr.bf16.mxu1 %v3851_v19  ;;  %v1309_v51 = vld [vmem:[%s5668_s3 + $0x80] sm:$0xff]  ;;  %v1310_v52 = vld [vmem:[%s5668_s3 + $0x88] sm:$0xff]  ;;  %v1311_v63 = vld [vmem:[%s5668_s3 + $0x90] sm:$0xff]  ;;  %s5673_s15 = smov (!%p262_p3, %s3246_s15), 31  ;;  %vm2643_vm1 = vcmask 400384   ;;  %s3983_s19 = smov 1  }
  0x17   : > { %v1341_v53 = vld [vmem:[%s5668_s3 + $0x180] sm:$0xff]  ;;  %v1493_v54 = vpack.c.bf16 %v1310_v52, %v1309_v51  ;;  %v1294_v56 = vld [vmem:[%s5668_s3 + $0x8] sm:$0xff]  ;;  %v1312_v0 = vld [vmem:[%s5668_s3 + $0x98] sm:$0xff]  ;;  %s3806_s22 = smul.u32 48, %s5673_s15 }
  0x18   : > { %3300 = vmatmul.mubr.msk.bf16.vlgmr.msra.gmra.mrb[0].mxu0 %vm571_vm0, %v4089_v20  ;;  %3301 = vmatmul.mubr.msk.bf16.vlgmr.msra.gmra.mrb[0].mxu1 %vm571_vm0, %v4089_v20  ;;  %v1293_v55 = vld [vmem:[%s5668_s3] sm:$0xff]  ;;  %v1342_v57 = vld [vmem:[%s5668_s3 + $0x188] sm:$0xff]  ;;  %v1343_v1 = vld [vmem:[%s5668_s3 + $0x190] sm:$0xff] }
  0x19   : > { %658 = vmatpush1.bf16.msra.mxu0 %v3846_v21  ;;  %699 = vmatpush1.bf16.msra.mxu1 %v3849_v22  ;;  %v1485_v58 = vpack.c.bf16 %v1294_v56, %v1293_v55  ;;  %v1509_v59 = vpack.c.bf16 %v1342_v57, %v1341_v53  ;;  %v1325_v60 = vld [vmem:[%s5668_s3 + $0x100] sm:$0xff]  ;;  %v1326_v61 = vld [vmem:[%s5668_s3 + $0x108] sm:$0xff]  ;;  %v1295_v3 = vld [vmem:[%s5668_s3 + $0x10] sm:$0xff]  ;;  %s4438_s20 = scalar_lea.vmem %s5669_s4, %s3806_s22 }
  0x1a   : > { %659 = vmatprep.subr.bf16.mxu0 %v3854_v23  ;;  %700 = vmatprep.subr.bf16.mxu1 %v3857_v24  ;;  %v1501_v62 = vpack.c.bf16 %v1326_v61, %v1325_v60  ;;  %v1296_v4 = vld [vmem:[%s5668_s3 + $0x18] sm:$0xff]  ;;  %v1327_v8 = vld [vmem:[%s5668_s3 + $0x110] sm:$0xff]  ;;  %v1313_v11 = vld [vmem:[%s5668_s3 + $0xa0] sm:$0xff] }
  0x1b   : > { %689 = vmatprep.mubr.bf16.mxu0 %v3982_v2  ;;  %730 = vmatprep.mubr.bf16.mxu1 %v3982_v2  ;;  %v1344_v5 = vld [vmem:[%s5668_s3 + $0x198] sm:$0xff]  ;;  %v1486_v6 = vpack.c.bf16 %v1296_v4, %v1295_v3  ;;  %v1314_v12 = vld [vmem:[%s5668_s3 + $0xa8] sm:$0xff]  ;;  %v1345_v13 = vld [vmem:[%s5668_s3 + $0x1a0] sm:$0xff] }
  0x1c   : > { %v1510_v7 = vpack.c.bf16 %v1344_v5, %v1343_v1  ;;  %v1328_v9 = vld [vmem:[%s5668_s3 + $0x118] sm:$0xff]  ;;  %v1495_v14 = vpack.c.bf16 %v1314_v12, %v1313_v11  ;;  %v1297_v15 = vld [vmem:[%s5668_s3 + $0x20] sm:$0xff]  ;;  %v1298_v16 = vld [vmem:[%s5668_s3 + $0x28] sm:$0xff] }
  0x1d   : > { %660 = vmatpush1.bf16.msra.mxu0 %v3852_v25  ;;  %701 = vmatpush1.bf16.msra.mxu1 %v3855_v26  ;;  %v1502_v10 = vpack.c.bf16 %v1328_v9, %v1327_v8  ;;  %v1346_v17 = vld [vmem:[%s5668_s3 + $0x1a8] sm:$0xff]  ;;  %v1487_v18 = vpack.c.bf16 %v1298_v16, %v1297_v15  ;;  %v1315_v23 = vld [vmem:[%s5668_s3 + $0xb0] sm:$0xff]  ;;  %v1316_v24 = vld [vmem:[%s5668_s3 + $0xb8] sm:$0xff] }
  0x1e   : > { %661 = vmatprep.subr.bf16.mxu0 %v3860_v27  ;;  %702 = vmatprep.subr.bf16.mxu1 %v3863_v28  ;;  %v1511_v19 = vpack.c.bf16 %v1346_v17, %v1345_v13  ;;  %v1330_v21 = vld [vmem:[%s5668_s3 + $0x128] sm:$0xff]  ;;  %v1347_v25 = vld [vmem:[%s5668_s3 + $0x1b0] sm:$0xff]  ;;  %v1496_v26 = vpack.c.bf16 %v1316_v24, %v1315_v23  ;;  %v1300_v28 = vld [vmem:[%s5668_s3 + $0x38] sm:$0xff] }
  0x1f   : > { %v1299_v27 = vld [vmem:[%s5668_s3 + $0x30] sm:$0xff]  ;;  %v1304_v52 = vld [vmem:[%s5668_s3 + $0x58] sm:$0xff]  ;;  %v1322_v60 = vld [vmem:[%s5668_s3 + $0xe8] sm:$0xff] }
  0x20   : > { %v1303_v51 = vld [vmem:[%s5668_s3 + $0x50] sm:$0xff]  ;;  %v1352_v53 = vld [vmem:[%s5668_s3 + $0x1d8] sm:$0xff]  ;;  %v1353_v61 = vld [vmem:[%s5668_s3 + $0x1e0] sm:$0xff] }
  0x21   : > { %662 = vmatpush1.bf16.msra.mxu0 %v3858_v29  ;;  %703 = vmatpush1.bf16.msra.mxu1 %v3861_v30  ;;  %v1348_v29 = vld [vmem:[%s5668_s3 + $0x1b8] sm:$0xff]  ;;  %v1488_v30 = vpack.c.bf16 %v1300_v28, %v1299_v27  ;;  %v1335_v56 = vld [vmem:[%s5668_s3 + $0x150] sm:$0xff]  ;;  %v1354_v1 = vld [vmem:[%s5668_s3 + $0x1e8] sm:$0xff] }
  0x22   : > { %663 = vmatprep.subr.bf16.mxu0 %v3866_v31  ;;  %704 = vmatprep.subr.bf16.mxu1 %v3869_v32  ;;  %v1512_v31 = vpack.c.bf16 %v1348_v29, %v1347_v25  ;;  %v1331_v32 = vld [vmem:[%s5668_s3 + $0x130] sm:$0xff]  ;;  %v1336_v57 = vld [vmem:[%s5668_s3 + $0x158] sm:$0xff]  ;;  %v1515_v3 = vpack.c.bf16 %v1354_v1, %v1353_v61  ;;  %v1337_v4 = vld [vmem:[%s5668_s3 + $0x160] sm:$0xff]  ;;  %v825_v25 = vlaneseq }
  0x23   : > { %v1338_v5 = vld [vmem:[%s5668_s3 + $0x168] sm:$0xff]  ;;  %v1324_v8 = vld [vmem:[%s5668_s3 + $0xf8] sm:$0xff]  ;;  %v1307_v9 = vld [vmem:[%s5668_s3 + $0x70] sm:$0xff] }
  0x24   : > { %v1308_v11 = vld [vmem:[%s5668_s3 + $0x78] sm:$0xff]  ;;  %v1355_v12 = vld [vmem:[%s5668_s3 + $0x1f0] sm:$0xff]  ;;  %v1406_v23 = vld [vmem:[%s5668_s3 + $0x388] sm:$0xff] }
  0x25   : > { %664 = vmatpush1.bf16.msra.mxu0 %v3864_v33  ;;  %705 = vmatpush1.bf16.msra.mxu1 %v3867_v34  ;;  %v1332_v33 = vld [vmem:[%s5668_s3 + $0x138] sm:$0xff]  ;;  %v1339_v16 = vld [vmem:[%s5668_s3 + $0x170] sm:$0xff]  ;;  %v821_v29 = vld [vmem:[%s5667_s2] sm:$0xff] }
  0x26   : > { %739 = vmatprep.subr.bf16.mxu0 %v3872_v35  ;;  %780 = vmatprep.subr.bf16.mxu1 %v3875_v36  ;;  %v1504_v34 = vpack.c.bf16 %v1332_v33, %v1331_v32  ;;  %v1317_v35 = vld [vmem:[%s5668_s3 + $0xc0] sm:$0xff]  ;;  %v1318_v36 = vld [vmem:[%s5668_s3 + $0xc8] sm:$0xff]  ;;  %v1356_v13 = vld [vmem:[%s5668_s3 + $0x1f8] sm:$0xff] }
  0x27   : > { %v1516_v15 = vpack.c.bf16 %v1356_v13, %v1355_v12  ;;  %v1340_v17 = vld [vmem:[%s5668_s3 + $0x178] sm:$0xff] }
  0x28   : > { %3302 = vmatmul.mubr.msk.bf16.vlgmr.msra.gmra.mrb[4].mxu0 %vm571_vm0, %v4089_v20  ;;  %3303 = vmatmul.mubr.msk.bf16.vlgmr.msra.gmra.mrb[4].mxu1 %vm571_vm0, %v4089_v20 }
  0x29   : > { %740 = vmatpush1.bf16.msra.mxu0 %v3870_v37  ;;  %781 = vmatpush1.bf16.msra.mxu1 %v3873_v38  ;;  %v1349_v37 = vld [vmem:[%s5668_s3 + $0x1c0] sm:$0xff]  ;;  %v1497_v38 = vpack.c.bf16 %v1318_v36, %v1317_v35 }
  0x2a   : > { %741 = vmatprep.subr.bf16.mxu0 %v3878_v39  ;;  %782 = vmatprep.subr.bf16.mxu1 %v3881_v40  ;;  %v1301_v39 = vld [vmem:[%s5668_s3 + $0x40] sm:$0xff]  ;;  %v1302_v40 = vld [vmem:[%s5668_s3 + $0x48] sm:$0xff] }
  0x2b   : > { %771 = vmatprep.mubr.bf16.mxu0 %v3982_v2  ;;  %812 = vmatprep.mubr.bf16.mxu1 %v3982_v2  ;;  %v1494_v2 = vpack.c.bf16 %v1312_v0, %v1311_v63  ;;  %v1305_v63 = vld [vmem:[%s5668_s3 + $0x60] sm:$0xff]  ;;  %v1306_v0 = vld [vmem:[%s5668_s3 + $0x68] sm:$0xff] }
  0x2d   : > { %742 = vmatpush1.bf16.msra.mxu0 %v3876_v41  ;;  %783 = vmatpush1.bf16.msra.mxu1 %v3879_v42  ;;  %v1350_v41 = vld [vmem:[%s5668_s3 + $0x1c8] sm:$0xff]  ;;  %v1489_v42 = vpack.c.bf16 %v1302_v40, %v1301_v39 }
  0x2e   : > { %743 = vmatprep.subr.bf16.mxu0 %v3884_v43  ;;  %784 = vmatprep.subr.bf16.mxu1 %v3887_v44  ;;  %v1513_v43 = vpack.c.bf16 %v1350_v41, %v1349_v37  ;;  %v1333_v44 = vld [vmem:[%s5668_s3 + $0x140] sm:$0xff] }
  0x31   : > { %744 = vmatpush1.bf16.msra.mxu0 %v3882_v45  ;;  %785 = vmatpush1.bf16.msra.mxu1 %v3885_v46  ;;  %v1334_v45 = vld [vmem:[%s5668_s3 + $0x148] sm:$0xff] }
  0x32   : > { %745 = vmatprep.subr.bf16.mxu0 %v3890_v47  ;;  %786 = vmatprep.subr.bf16.mxu1 %v3893_v48  ;;  %v1505_v46 = vpack.c.bf16 %v1334_v45, %v1333_v44  ;;  %v1319_v47 = vld [vmem:[%s5668_s3 + $0xd0] sm:$0xff]  ;;  %v1320_v48 = vld [vmem:[%s5668_s3 + $0xd8] sm:$0xff] }
  0x35   : > { %746 = vmatpush1.bf16.msra.mxu0 %v3888_v49  ;;  %787 = vmatpush1.bf16.msra.mxu1 %v3891_v50  ;;  %v1351_v49 = vld [vmem:[%s5668_s3 + $0x1d0] sm:$0xff]  ;;  %v1498_v50 = vpack.c.bf16 %v1320_v48, %v1319_v47 }
  0x36   : > { %3422 = vmatprep.subr.bf16.mxu0 %v1493_v54  ;;  %3486 = vmatprep.subr.bf16.mxu1 %v1509_v59  ;;  %v1490_v54 = vpack.c.bf16 %v1304_v52, %v1303_v51  ;;  %v1514_v55 = vpack.c.bf16 %v1352_v53, %v1351_v49  ;;  %v1321_v59 = vld [vmem:[%s5668_s3 + $0xe0] sm:$0xff] }
  0x38   : > { %3304 = vmatmul.mubr.msk.bf16.vlgmr.msra.gmra.mrb[8].mxu0 %vm571_vm0, %v4089_v20  ;;  %3305 = vmatmul.mubr.msk.bf16.vlgmr.msra.gmra.mrb[8].mxu1 %vm571_vm0, %v4089_v20  ;;  %v1329_v20 = vld [vmem:[%s5668_s3 + $0x120] sm:$0xff] }
  0x39   : > { %3423 = vmatpush3.bf16.msra.mxu0 %v1485_v58  ;;  %3487 = vmatpush3.bf16.msra.mxu1 %v1501_v62  ;;  %v1503_v22 = vpack.c.bf16 %v1330_v21, %v1329_v20  ;;  %v1506_v58 = vpack.c.bf16 %v1336_v57, %v1335_v56  ;;  %v1499_v62 = vpack.c.bf16 %v1322_v60, %v1321_v59  ;;  %v1374_v20 = vld [vmem:[%s5668_s3 + $0x288] sm:$0xff] }
  0x3a   : > { %3424 = vmatprep.subr.bf16.mxu0 %v1494_v2  ;;  %3488 = vmatprep.subr.bf16.mxu1 %v1510_v7  ;;  %v1491_v2 = vpack.c.bf16 %v1306_v0, %v1305_v63  ;;  %v1323_v7 = vld [vmem:[%s5668_s3 + $0xf0] sm:$0xff] }
  0x3d   : > { %3425 = vmatpush3.bf16.msra.mxu0 %v1486_v6  ;;  %3489 = vmatpush3.bf16.msra.mxu1 %v1502_v10  ;;  %v1507_v6 = vpack.c.bf16 %v1338_v5, %v1337_v4  ;;  %v1500_v10 = vpack.c.bf16 %v1324_v8, %v1323_v7 }
  0x3e   : > { %3426 = vmatprep.subr.bf16.mxu0 %v1495_v14  ;;  %3490 = vmatprep.subr.bf16.mxu1 %v1511_v19  ;;  %v1492_v14 = vpack.c.bf16 %v1308_v11, %v1307_v9  ;;  %v1373_v19 = vld [vmem:[%s5668_s3 + $0x280] sm:$0xff] }
  0x3f   : > { %v1525_v21 = vpack.c.bf16 %v1374_v20, %v1373_v19  ;;  %v4431_v20 = vld [vmem:[%s5667_s2 + $0x8] sm:$0xf] }
  0x41   : > { %3427 = vmatpush3.bf16.msra.mxu0 %v1487_v18  ;;  %3491 = vmatpush3.bf16.msra.mxu1 %v1503_v22  ;;  %v1508_v18 = vpack.c.bf16 %v1340_v17, %v1339_v16  ;;  %v1405_v22 = vld [vmem:[%s5668_s3 + $0x380] sm:$0xff] }
  0x42   : > { %3428 = vmatprep.subr.bf16.mxu0 %v1496_v26  ;;  %3492 = vmatprep.subr.bf16.mxu1 %v1512_v31  ;;  %v1541_v24 = vpack.c.bf16 %v1406_v23, %v1405_v22  ;;  %v4401_v26 = vshrl.u32 %v825_v25, 7 }
  0x44   : > { %v4404_v27 = vsub.s32 0, %v4401_v26  ;;  %v835_v28 = vsub.s32 2, %v4401_v26  ;;  %v839_v31 = vsub.s32 3, %v4401_v26  ;;  %v843_v52 = vsub.s32 4, %v4401_v26 }
  0x45   : > { %3429 = vmatpush3.bf16.msra.mxu0 %v1488_v30  ;;  %3493 = vmatpush3.bf16.msra.mxu1 %v1504_v34  ;;  %v831_v30 = vsub.s32 1, %v4401_v26  ;;  %v851_v53 = vsub.s32 6, %v4401_v26 }
  0x46   : > { %3430 = vmatprep.subr.bf16.mxu0 %v1497_v38  ;;  %3494 = vmatprep.subr.bf16.mxu1 %v1513_v43  ;;  %v828_v32 = vrot.slane %v821_v29, %v4404_v27  ;;  %v836_v33 = vrot.slane %v821_v29, %v835_v28  ;;  %v840_v35 = vrot.slane %v821_v29, %v839_v31 }
  0x47   : > { %v832_v34 = vrot.slane %v821_v29, %v831_v30  ;;  %v844_v56 = vrot.slane %v821_v29, %v843_v52  ;;  %v852_v57 = vrot.slane %v821_v29, %v851_v53 }
  0x49   : > { %3431 = vmatpush3.bf16.msra.mxu0 %v1489_v42  ;;  %3495 = vmatpush3.bf16.msra.mxu1 %v1505_v46 }
  0x4a   : > { %3432 = vmatprep.subr.bf16.mxu0 %v1498_v50  ;;  %3496 = vmatprep.subr.bf16.mxu1 %v1514_v55  ;;  %v855_v55 = vsub.s32 7, %v4401_v26 }
  0x4c   : > { %v856_v59 = vrot.slane %v821_v29, %v855_v55 }
  0x4d   : > { %3433 = vmatpush3.bf16.msra.mxu0 %v1490_v54  ;;  %3497 = vmatpush3.bf16.msra.mxu1 %v1506_v58  ;;  %v847_v54 = vsub.s32 5, %v4401_v26 }
  0x4e   : > { %3434 = vmatprep.subr.bf16.mxu0 %v1499_v62  ;;  %3498 = vmatprep.subr.bf16.mxu1 %v1515_v3 }
  0x4f   : > { %v848_v58 = vrot.slane %v821_v29, %v847_v54  ;;  %v860_v29 = vrot.slane %v4431_v20, %v4404_v27 }
  0x51   : > { %3435 = vmatpush3.bf16.msra.mxu0 %v1491_v2  ;;  %3499 = vmatpush3.bf16.msra.mxu1 %v1507_v6 }
  0x52   : > { %3436 = vmatprep.subr.bf16.mxu0 %v1500_v10  ;;  %3500 = vmatprep.subr.bf16.mxu1 %v1516_v15 }
  0x55   : > { %3437 = vmatpush3.bf16.msra.mxu0 %v1492_v14  ;;  %3501 = vmatpush3.bf16.msra.mxu1 %v1508_v18 }
  0x56   : > { %3550 = vmatprep.subr.bf16.mxu0 %v1525_v21  ;;  %3614 = vmatprep.subr.bf16.mxu1 %v1541_v24 }
  0xeb   : > { %v609_v36 = vpop.f32.mrb[0].mxu0  ;;  %v650_v37 = vpop.f32.mrb[0].mxu1 }
  0xec   : > { %v885_v38 = vadd.f32 %v828_v32, %v609_v36  ;;  %v887_v39 = vadd.f32 %v836_v33, %v650_v37  ;;  %v611_v40 = vpop.f32.mrb[1].mxu0  ;;  %v652_v41 = vpop.f32.mrb[1].mxu1 }
  0xed   : > { %v886_v42 = vadd.f32 %v832_v34, %v611_v40  ;;  %v888_v43 = vadd.f32 %v840_v35, %v652_v41  ;;  %v613_v44 = vpop.f32.mrb[2].mxu0  ;;  %v654_v45 = vpop.f32.mrb[2].mxu1 }
  0xee   : > { %v3306_v46 = vmul.f32 -1.442695, %v885_v38  ;;  %v3308_v47 = vmul.f32 -1.442695, %v887_v39  ;;  %v614_v48 = vpop.f32.mrb[3].mxu0  ;;  %v655_v49 = vpop.f32.mrb[3].mxu1  ;;  %v864_v45 = vrot.slane %v4431_v20, %v831_v30 }
  0xef   : > { %v3307_v50 = vmul.f32 -1.442695, %v886_v42  ;;  %v3309_v51 = vmul.f32 -1.442695, %v888_v43  ;;  %v988_v30 = vld [vmem:[%s4438_s20 + $0x38] sm:$0xff] }
  0xf0   : > { %3894 = vpow2.f32 %v3306_v46 }
  0xf1   : > { %3896 = vpow2.f32 %v3308_v47 }
  0xf2   : > { %3898 = vpow2.f32 %v3307_v50  ;;  %v981_v50 = vld [vmem:[%s4438_s20] sm:$0xff] }
  0xf3   : > { %3900 = vpow2.f32 %v3309_v51  ;;  %v987_v51 = vld [vmem:[%s4438_s20 + $0x30] sm:$0xff] }
  0xfa   : > { %v3895_v60 = vpop.eup %3894 }
  0xfb   : > { %v3897_v61 = vpop.eup %3896  ;;  %v933_v62 = vadd.f32 1.0, %v3895_v60  ;;  %v691_v63 = vpop.f32.mrb[4].mxu0 }
  0xfc   : > { %v732_v0 = vpop.f32.mrb[4].mxu1  ;;  %v3899_v1 = vpop.eup %3898  ;;  %v935_v2 = vadd.f32 1.0, %v3897_v61  ;;  %v889_v3 = vadd.f32 %v844_v56, %v691_v63 }
  0xfd   : > { %v693_v4 = vpop.f32.mrb[5].mxu0  ;;  %v891_v5 = vadd.f32 %v852_v57, %v732_v0  ;;  %v734_v6 = vpop.f32.mrb[5].mxu1  ;;  %3902 = vrcp.f32 %v933_v62  ;;  %v934_v8 = vadd.f32 1.0, %v3899_v1  ;;  %v999_v0 = vld [vmem:[%s4438_s20 + $0x90] sm:$0xff]  ;;  %v994_v1 = vld [vmem:[%s4438_s20 + $0x68] sm:$0xff] }
  0xfe   : > { %v3901_v7 = vpop.eup %3900  ;;  %v890_v9 = vadd.f32 %v848_v58, %v693_v4  ;;  %v695_v10 = vpop.f32.mrb[6].mxu0  ;;  %v892_v11 = vadd.f32 %v856_v59, %v734_v6  ;;  %3904 = vrcp.f32 %v935_v2  ;;  %v3310_v14 = vmul.f32 -1.442695, %v889_v3  ;;  %v982_v58 = vld [vmem:[%s4438_s20 + $0x8] sm:$0xff]  ;;  %v993_v59 = vld [vmem:[%s4438_s20 + $0x60] sm:$0xff]  ;;  %v1000_v2 = vld [vmem:[%s4438_s20 + $0x98] sm:$0xff] }
  0xff   : > { %v736_v12 = vpop.f32.mrb[6].mxu1  ;;  %v936_v13 = vadd.f32 1.0, %v3901_v7  ;;  %v696_v15 = vpop.f32.mrb[7].mxu0  ;;  %3906 = vrcp.f32 %v934_v8  ;;  %v3312_v17 = vmul.f32 -1.442695, %v891_v5  ;;  %v1357_v5 = vld [vmem:[%s5668_s3 + $0x200] sm:$0xff]  ;;  %v868_v8 = vrot.slane %v4431_v20, %v835_v28 }
 0x100   : > { %v3311_v16 = vmul.f32 -1.442695, %v890_v9  ;;  %v737_v18 = vpop.f32.mrb[7].mxu1  ;;  %v3313_v19 = vmul.f32 -1.442695, %v892_v11  ;;  %v1358_v6 = vld [vmem:[%s5668_s3 + $0x208] sm:$0xff] }
 0x101   : > { %3908 = vrcp.f32 %v936_v13  ;;  %v4470_v7 = vld [vmem:[%s5668_s3 + $0x300] sm:$0xff]  ;;  %v4480_v10 = vld [vmem:[%s5668_s3 + $0x308] sm:$0xff]  ;;  %v4485_v11 = vld [vmem:[%s5668_s3 + $0x290] sm:$0xff] }
 0x102   : > { %3910 = vpow2.f32 %v3310_v14  ;;  %v4490_v12 = vld [vmem:[%s5668_s3 + $0x298] sm:$0xff]  ;;  %v4503_v18 = vld [vmem:[%s5668_s3 + $0x210] sm:$0xff] }
 0x103   : > { %3912 = vpow2.f32 %v3311_v16 }
 0x104   : > { %3914 = vpow2.f32 %v3312_v17 }
 0x105   : > { %3916 = vpow2.f32 %v3313_v19  ;;  %v4508_v19 = vld [vmem:[%s5668_s3 + $0x218] sm:$0xff] }
 0x107   : > { %v3903_v21 = vpop.eup %3902 }
 0x108   : > { %v3905_v22 = vpop.eup %3904  ;;  %v969_v23 = vpack.c.bf16 %v3903_v21, %v3903_v21  ;;  %v4513_v21 = vld [vmem:[%s5668_s3 + $0x390] sm:$0xff] }
 0x109   : > { %v3907_v24 = vpop.eup %3906  ;;  %v971_v25 = vpack.c.bf16 %v3905_v22, %v3905_v22 }
 0x10a   : > { %v1078_v33 = vpack.i.b16 %v969_v23, %v969_v23  ;;  %v970_v34 = vpack.c.bf16 %v3907_v24, %v3907_v24 }
 0x10b   : > { %v3909_v32 = vpop.eup %3908  ;;  %v1092_v36 = vpack.i.b16 %v971_v25, %v971_v25  ;;  %v773_v38 = vpop.f32.mrb[8].mxu0 }
 0x10c   : > { %v3911_v35 = vpop.eup %3910  ;;  %v972_v37 = vpack.c.bf16 %v3909_v32, %v3909_v32  ;;  %v4440_v39 = vpop.f32.mrb[8].mxu1  ;;  %v1083_v41 = vrot.slane %v1078_v33, %v4404_v27  ;;  %v1085_v42 = vpack.i.b16 %v970_v34, %v970_v34  ;;  %v893_v53 = vadd.f32 %v860_v29, %v773_v38  ;;  %v1408_v29 = vld [vmem:[%s5668_s3 + $0x398] sm:$0xff]  ;;  %v4529_v32 = vld [vmem:[%s5668_s3 + $0x310] sm:$0xff]  ;;  %v1005_v38 = vld [vmem:[%s4438_s20 + $0xc0] sm:$0xff] }
 0x10d   : > { %v3913_v40 = vpop.eup %3912  ;;  %v937_v43 = vadd.f32 1.0, %v3911_v35  ;;  %v775_v44 = vpop.f32.mrb[9].mxu0  ;;  %v1097_v48 = vrot.slane %v1092_v36, %v4404_v27  ;;  %v4534_v33 = vld [vmem:[%s5668_s3 + $0x318] sm:$0xff]  ;;  %v1517_v36 = vpack.c.bf16 %v1358_v6, %v1357_v5 }
 0x10e   : > { %v4446_v46 = vpop.f32.mrb[9].mxu1  ;;  %v3915_v47 = vpop.eup %3914  ;;  %v1099_v49 = vpack.i.b16 %v972_v37, %v972_v37  ;;  %v938_v52 = vadd.f32 1.0, %v3913_v40  ;;  %v1090_v57 = vrot.slane %v1085_v42, %v4404_v27  ;;  %v3314_v13 = vmul.f32 -1.442695, %v893_v53  ;;  %v4542_v40 = vld [vmem:[%s5668_s3 + $0x2a0] sm:$0xff] }
 0x10f   : > { %v777_v54 = vpop.f32.mrb[10].mxu0  ;;  %v818_v55 = vpop.f32.mrb[10].mxu1  ;;  %3918 = vrcp.f32 %v937_v43  ;;  %v939_v60 = vadd.f32 1.0, %v3915_v47  ;;  %v894_v28 = vadd.f32 %v864_v45, %v775_v44  ;;  %v1533_v37 = vpack.c.bf16 %v4480_v10, %v4470_v7  ;;  %v4552_v42 = vld [vmem:[%s5668_s3 + $0x220] sm:$0xff] }
 0x110   : > { %v3917_v56 = vpop.eup %3916  ;;  %v778_v61 = vpop.f32.mrb[11].mxu0  ;;  %v1104_v63 = vrot.slane %v1099_v49, %v4404_v27  ;;  %3920 = vrcp.f32 %v938_v52  ;;  %v4459_v4 = vcombine.low %v1083_v41, %v1090_v57  ;;  %v4547_v41 = vld [vmem:[%s5668_s3 + $0x2a8] sm:$0xff]  ;;  %v1526_v47 = vpack.c.bf16 %v4490_v12, %v4485_v11  ;;  %v4566_v49 = vld [vmem:[%s5668_s3 + $0x3a0] sm:$0xff]  ;;  %v1011_v52 = vld [vmem:[%s4438_s20 + $0xf0] sm:$0xff] }
 0x111   : > { %v819_v62 = vpop.f32.mrb[11].mxu1  ;;  %v940_v3 = vadd.f32 1.0, %v3917_v56  ;;  %3922 = vrcp.f32 %v939_v60  ;;  %v1542_v53 = vpack.c.bf16 %v1408_v29, %v4513_v21  ;;  %v4580_v54 = vld [vmem:[%s5668_s3 + $0x320] sm:$0xff]  ;;  %v4585_v55 = vld [vmem:[%s5668_s3 + $0x328] sm:$0xff]  ;;  %v3315_v56 = vmul.f32 -1.442695, %v894_v28 }
 0x112   : > { %v4475_v9 = vcombine.low %v1097_v48, %v1104_v63  ;;  %v1197_v14 = vmul.bf16 %v4459_v4, %v981_v50  ;;  %v1203_v15 = vmul.bf16 %v4459_v4, %v987_v51  ;;  %v4495_v16 = vmul.bf16 %v4459_v4, %v993_v59  ;;  %v4561_v48 = vld [vmem:[%s5668_s3 + $0x228] sm:$0xff]  ;;  %v1012_v62 = vld [vmem:[%s4438_s20 + $0xf8] sm:$0xff] }
 0x113   : > { %3924 = vrcp.f32 %v940_v3  ;;  %v4498_v17 = vmul.bf16 %v4459_v4, %v999_v0  ;;  %v4571_v50 = vld [vmem:[%s5668_s3 + $0x3a8] sm:$0xff]  ;;  %v1518_v51 = vpack.c.bf16 %v4508_v19, %v4503_v18  ;;  %v872_v57 = vrot.slane %v4431_v20, %v839_v31  ;;  %v4619_v3 = vld [vmem:[%s5668_s3 + $0x2b8] sm:$0xff] }
 0x114   : > { %v1198_v22 = vmul.bf16 %v4475_v9, %v982_v58  ;;  %v1204_v23 = vmul.bf16 %v4475_v9, %v988_v30  ;;  %v4518_v24 = vmul.bf16 %v4475_v9, %v994_v1  ;;  %v4521_v25 = vmul.bf16 %v4475_v9, %v1000_v2  ;;  %v1006_v61 = vld [vmem:[%s4438_s20 + $0xc8] sm:$0xff]  ;;  %v4614_v2 = vld [vmem:[%s5668_s3 + $0x2b0] sm:$0xff] }
 0x115   : > { %v3325_v34 = vcombine.high %v1197_v14, %v1203_v15  ;;  %v3324_v35 = vcombine.low %v1197_v14, %v1203_v15  ;;  %v3337_v58 = vcombine.high %v4495_v16, %v4498_v17  ;;  %v1534_v30 = vpack.c.bf16 %v4534_v33, %v4529_v32  ;;  %v1017_v14 = vld [vmem:[%s4438_s20 + $0x120] sm:$0xff] }
 0x116   : > { %v3327_v43 = vcombine.high %v1198_v22, %v1204_v23  ;;  %v3326_v44 = vcombine.low %v1198_v22, %v1204_v23  ;;  %v3339_v45 = vcombine.high %v4518_v24, %v4521_v25  ;;  %3926 = vpow2.f32 %v3314_v13  ;;  %v1412_v22 = vld [vmem:[%s5668_s3 + $0x3b8] sm:$0xff] }
 0x117   : > { %2093 = vmatprep.mubr.bf16.mxu0 %v3325_v34  ;;  %v895_v59 = vadd.f32 %v868_v8, %v4440_v39  ;;  %v1527_v26 = vpack.c.bf16 %v4547_v41, %v4542_v40  ;;  %v1519_v31 = vpack.c.bf16 %v4561_v48, %v4552_v42  ;;  %v1543_v20 = vpack.c.bf16 %v4571_v50, %v4566_v49  ;;  %v1363_v34 = vld [vmem:[%s5668_s3 + $0x230] sm:$0xff]  ;;  %v1024_v49 = vld [vmem:[%s4438_s20 + $0x158] sm:$0xff]  ;;  %v1366_v42 = vld [vmem:[%s5668_s3 + $0x248] sm:$0xff] }
 0x118   : > { %2190 = vmatprep.mubr.bf16.mxu1 %v3327_v43  ;;  %2094 = vmatmul.mubr.bf16.vlgmr.msra.gmra.mrb[12].mxu0 %v3324_v35  ;;  %v4604_v0 = vmul.bf16 %v4459_v4, %v1005_v38  ;;  %v4607_v39 = vmul.bf16 %v4459_v4, %v1011_v52  ;;  %v1535_v1 = vpack.c.bf16 %v4585_v55, %v4580_v54  ;;  %3928 = vpow2.f32 %v3315_v56  ;;  %v1364_v35 = vld [vmem:[%s5668_s3 + $0x238] sm:$0xff]  ;;  %v1382_v38 = vld [vmem:[%s5668_s3 + $0x2c8] sm:$0xff]  ;;  %v1023_v43 = vld [vmem:[%s4438_s20 + $0x150] sm:$0xff] }
 0x119   : > { %v3919_v60 = vpop.eup %3918  ;;  %2191 = vmatmul.mubr.bf16.vlgmr.msra.gmra.mrb[12].mxu1 %v3326_v44  ;;  %3551 = vmatpush3.bf16.msra.mxu0 %v1517_v36  ;;  %v896_v8 = vadd.f32 %v872_v57, %v4446_v46  ;;  %v4623_v11 = vmul.bf16 %v4475_v9, %v1006_v61  ;;  %v4626_v12 = vmul.bf16 %v4475_v9, %v1012_v62  ;;  %v3316_v28 = vmul.f32 -1.442695, %v895_v59  ;;  %v1411_v46 = vld [vmem:[%s5668_s3 + $0x3b0] sm:$0xff]  ;;  %v1396_v36 = vld [vmem:[%s5668_s3 + $0x338] sm:$0xff]  ;;  %v1018_v44 = vld [vmem:[%s4438_s20 + $0x128] sm:$0xff] }
 0x11a   : > { %v3921_v63 = vpop.eup %3920  ;;  %2101 = vmatprep.mubr.bf16.mxu0 %v3337_v58  ;;  %2198 = vmatprep.mubr.bf16.mxu1 %v3339_v45  ;;  %v973_v6 = vpack.c.bf16 %v3919_v60, %v3919_v60  ;;  %v1528_v21 = vpack.c.bf16 %v4619_v3, %v4614_v2  ;;  %v3336_v23 = vcombine.low %v4495_v16, %v4498_v17  ;;  %v1395_v16 = vld [vmem:[%s5668_s3 + $0x330] sm:$0xff]  ;;  %v1414_v56 = vld [vmem:[%s5668_s3 + $0x3c8] sm:$0xff]  ;;  %v1365_v60 = vld [vmem:[%s5668_s3 + $0x240] sm:$0xff] }
 0x11b   : > { %v3923_v5 = vpop.eup %3922  ;;  %3615 = vmatpush3.bf16.msra.mxu1 %v1533_v37  ;;  %3552 = vmatprep.subr.bf16.mxu0 %v1526_v47  ;;  %v974_v7 = vpack.c.bf16 %v3921_v63, %v3921_v63  ;;  %v3338_v29 = vcombine.low %v4518_v24, %v4521_v25  ;;  %v3349_v32 = vcombine.high %v4604_v0, %v4607_v39  ;;  %v1381_v37 = vld [vmem:[%s5668_s3 + $0x2c0] sm:$0xff]  ;;  %v3317_v40 = vmul.f32 -1.442695, %v896_v8  ;;  %v1383_v63 = vld [vmem:[%s5668_s3 + $0x2d0] sm:$0xff] }
 0x11c   : > { %3616 = vmatprep.subr.bf16.mxu1 %v1542_v53  ;;  %v975_v13 = vpack.c.bf16 %v3923_v5, %v3923_v5  ;;  %v1106_v15 = vpack.i.b16 %v973_v6, %v973_v6  ;;  %v3351_v41 = vcombine.high %v4623_v11, %v4626_v12  ;;  %v1544_v47 = vpack.c.bf16 %v1412_v22, %v1411_v46  ;;  %v1413_v53 = vld [vmem:[%s5668_s3 + $0x3c0] sm:$0xff]  ;;  %v1415_v3 = vld [vmem:[%s5668_s3 + $0x3d0] sm:$0xff]  ;;  %v1416_v5 = vld [vmem:[%s5668_s3 + $0x3d8] sm:$0xff] }
 0x11d   : > { %v3925_v10 = vpop.eup %3924  ;;  %3553 = vmatpush3.bf16.msra.mxu0 %v1518_v51  ;;  %v1113_v18 = vpack.i.b16 %v974_v7, %v974_v7  ;;  %3930 = vpow2.f32 %v3316_v28  ;;  %v1520_v52 = vpack.c.bf16 %v1364_v35, %v1363_v34  ;;  %v4682_v58 = vmul.bf16 %v4459_v4, %v1017_v14  ;;  %v1397_v48 = vld [vmem:[%s5668_s3 + $0x340] sm:$0xff]  ;;  %v1035_v8 = vld [vmem:[%s4438_s20 + $0x1b0] sm:$0xff]  ;;  %v1386_v22 = vld [vmem:[%s5668_s3 + $0x2e8] sm:$0xff] }
 0x11e   : > { %v976_v19 = vpack.c.bf16 %v3925_v10, %v3925_v10  ;;  %3554 = vmatprep.subr.bf16.mxu0 %v1527_v26  ;;  %v1120_v33 = vpack.i.b16 %v975_v13, %v975_v13  ;;  %v1111_v17 = vrot.slane %v1106_v15, %v4404_v27  ;;  %v1529_v59 = vpack.c.bf16 %v1382_v38, %v1381_v37  ;;  %v1398_v26 = vld [vmem:[%s5668_s3 + $0x348] sm:$0xff]  ;;  %v1029_v7 = vld [vmem:[%s4438_s20 + $0x180] sm:$0xff]  ;;  %v1367_v28 = vld [vmem:[%s5668_s3 + $0x250] sm:$0xff] }
 0x11f   : > { %3617 = vmatpush3.bf16.msra.mxu1 %v1534_v30  ;;  %v1118_v24 = vrot.slane %v1113_v18, %v4404_v27  ;;  %v1536_v30 = vpack.c.bf16 %v1396_v36, %v1395_v16  ;;  %v4688_v61 = vmul.bf16 %v4459_v4, %v1023_v43  ;;  %3932 = vpow2.f32 %v3317_v40  ;;  %v1399_v18 = vld [vmem:[%s5668_s3 + $0x350] sm:$0xff]  ;;  %v1385_v46 = vld [vmem:[%s5668_s3 + $0x2e0] sm:$0xff]  ;;  %v1370_v37 = vld [vmem:[%s5668_s3 + $0x268] sm:$0xff] }
 0x120   : > { %v1127_v25 = vpack.i.b16 %v976_v19, %v976_v19  ;;  %2102 = vmatmul.mubr.bf16.gmra.mrb[16].mxu0 %v3336_v23  ;;  %3618 = vmatprep.subr.bf16.mxu1 %v1543_v20  ;;  %v1125_v45 = vrot.slane %v1120_v33, %v4404_v27  ;;  %v3927_v57 = vpop.eup %3926  ;;  %v4705_v54 = vmul.bf16 %v4475_v9, %v1018_v44  ;;  %v1400_v19 = vld [vmem:[%s5668_s3 + $0x358] sm:$0xff]  ;;  %v1418_v33 = vld [vmem:[%s5668_s3 + $0x3e8] sm:$0xff]  ;;  %v1401_v38 = vld [vmem:[%s5668_s3 + $0x360] sm:$0xff] }
 0x121   : > { %2199 = vmatmul.mubr.bf16.gmra.mrb[16].mxu1 %v3338_v29  ;;  %2109 = vmatprep.mubr.bf16.mxu0 %v3349_v32  ;;  %v4669_v50 = vcombine.low %v1111_v17, %v1118_v24  ;;  %v4708_v55 = vmul.bf16 %v4475_v9, %v1024_v49  ;;  %v1545_v20 = vpack.c.bf16 %v1414_v56, %v1413_v53  ;;  %v1036_v29 = vld [vmem:[%s4438_s20 + $0x1b8] sm:$0xff]  ;;  %v1417_v32 = vld [vmem:[%s5668_s3 + $0x3e0] sm:$0xff]  ;;  %v1402_v40 = vld [vmem:[%s5668_s3 + $0x368] sm:$0xff] }
 0x122   : > { %v1132_v51 = vrot.slane %v1127_v25, %v4404_v27  ;;  %2206 = vmatprep.mubr.bf16.mxu1 %v3351_v41  ;;  %3555 = vmatpush3.bf16.msra.mxu0 %v1519_v31  ;;  %v941_v31 = vadd.f32 1.0, %v3927_v57  ;;  %v3929_v2 = vpop.eup %3928  ;;  %v3348_v6 = vcombine.low %v4604_v0, %v4607_v39  ;;  %v1521_v10 = vpack.c.bf16 %v1366_v42, %v1365_v60  ;;  %v1368_v39 = vld [vmem:[%s5668_s3 + $0x258] sm:$0xff]  ;;  %v1369_v17 = vld [vmem:[%s5668_s3 + $0x260] sm:$0xff]  ;;  %v1371_v42 = vld [vmem:[%s5668_s3 + $0x270] sm:$0xff] }
 0x123   : > { %3619 = vmatpush3.bf16.msra.mxu1 %v1535_v1  ;;  %3556 = vmatprep.subr.bf16.mxu0 %v1528_v21  ;;  %v1384_v1 = vld [vmem:[%s5668_s3 + $0x2d8] sm:$0xff]  ;;  %v1537_v13 = vpack.c.bf16 %v1398_v26, %v1397_v48  ;;  %v3350_v14 = vcombine.low %v4623_v11, %v4626_v12  ;;  %v3361_v15 = vcombine.high %v4682_v58, %v4688_v61  ;;  %v1030_v12 = vld [vmem:[%s4438_s20 + $0x188] sm:$0xff]  ;;  %v942_v23 = vadd.f32 1.0, %v3929_v2  ;;  %v1041_v57 = vld [vmem:[%s4438_s20 + $0x1e0] sm:$0xff] }
 0x124   : > { %v4693_v62 = vcombine.low %v1125_v45, %v1132_v51  ;;  %3620 = vmatprep.subr.bf16.mxu1 %v1544_v47  ;;  %v1530_v0 = vpack.c.bf16 %v1384_v1, %v1383_v63  ;;  %3934 = vrcp.f32 %v941_v31  ;;  %v3363_v11 = vcombine.high %v4705_v54, %v4708_v55  ;;  %v1387_v47 = vld [vmem:[%s5668_s3 + $0x2f0] sm:$0xff]  ;;  %v1388_v49 = vld [vmem:[%s5668_s3 + $0x2f8] sm:$0xff]  ;;  %v1437_v1 = vld [vmem:[%s5668_s3 + $0x480] sm:$0xff] }
 0x125   : > { %v1546_v21 = vpack.c.bf16 %v1416_v5, %v1415_v3  ;;  %v1522_v35 = vpack.c.bf16 %v1368_v39, %v1367_v28  ;;  %v1538_v16 = vpack.c.bf16 %v1400_v19, %v1399_v18  ;;  %3936 = vrcp.f32 %v942_v23  ;;  %v1420_v53 = vld [vmem:[%s5668_s3 + $0x3f8] sm:$0xff]  ;;  %v1438_v2 = vld [vmem:[%s5668_s3 + $0x488] sm:$0xff] }
 0x126   : > { %3557 = vmatpush3.bf16.msra.mxu0 %v1520_v52  ;;  %v4762_v24 = vmul.bf16 %v4459_v4, %v1029_v7  ;;  %v4765_v25 = vmul.bf16 %v4459_v4, %v1035_v8  ;;  %v1531_v36 = vpack.c.bf16 %v1386_v22, %v1385_v46  ;;  %v4777_v43 = vmul.bf16 %v4475_v9, %v1030_v12  ;;  %v1419_v52 = vld [vmem:[%s5668_s3 + $0x3f0] sm:$0xff]  ;;  %v1469_v7 = vld [vmem:[%s5668_s3 + $0x580] sm:$0xff]  ;;  %v1470_v8 = vld [vmem:[%s5668_s3 + $0x588] sm:$0xff] }
 0x127   : > { %3621 = vmatpush3.bf16.msra.mxu1 %v1536_v30  ;;  %3558 = vmatprep.subr.bf16.mxu0 %v1529_v59  ;;  %v3931_v34 = vpop.eup %3930  ;;  %v4780_v44 = vmul.bf16 %v4475_v9, %v1036_v29  ;;  %v1547_v45 = vpack.c.bf16 %v1418_v33, %v1417_v32  ;;  %v3360_v56 = vcombine.low %v4682_v58, %v4688_v61  ;;  %v1047_v30 = vld [vmem:[%s4438_s20 + $0x210] sm:$0xff]  ;;  %v1372_v58 = vld [vmem:[%s5668_s3 + $0x278] sm:$0xff] }
 0x128   : > { %2110 = vmatmul.mubr.bf16.gmra.mrb[20].mxu0 %v3348_v6  ;;  %3622 = vmatprep.subr.bf16.mxu1 %v1545_v20  ;;  %v943_v41 = vadd.f32 1.0, %v3931_v34  ;;  %v1523_v59 = vpack.c.bf16 %v1370_v37, %v1369_v17  ;;  %v1539_v60 = vpack.c.bf16 %v1402_v40, %v1401_v38  ;;  %v3362_v48 = vcombine.low %v4705_v54, %v4708_v55  ;;  %v1403_v61 = vld [vmem:[%s5668_s3 + $0x370] sm:$0xff]  ;;  %v1404_v20 = vld [vmem:[%s5668_s3 + $0x378] sm:$0xff]  ;;  %v1042_v55 = vld [vmem:[%s4438_s20 + $0x1e8] sm:$0xff] }
 0x129   : > { %2207 = vmatmul.mubr.bf16.gmra.mrb[20].mxu1 %v3350_v14  ;;  %2117 = vmatprep.mubr.bf16.mxu0 %v3361_v15  ;;  %v3933_v51 = vpop.eup %3932  ;;  %v3373_v26 = vcombine.high %v4762_v24, %v4765_v25  ;;  %v1532_v31 = vpack.c.bf16 %v1388_v49, %v1387_v47  ;;  %v3375_v54 = vcombine.high %v4777_v43, %v4780_v44  ;;  %v1048_v6 = vld [vmem:[%s4438_s20 + $0x218] sm:$0xff]  ;;  %v1053_v34 = vld [vmem:[%s4438_s20 + $0x240] sm:$0xff]  ;;  %v1054_v17 = vld [vmem:[%s4438_s20 + $0x248] sm:$0xff] }
 0x12a   : > { %2214 = vmatprep.mubr.bf16.mxu1 %v3363_v11  ;;  %3559 = vmatpush3.bf16.msra.mxu0 %v1521_v10  ;;  %3938 = vrcp.f32 %v943_v41  ;;  %v1548_v63 = vpack.c.bf16 %v1420_v53, %v1419_v52  ;;  %v944_v3 = vadd.f32 1.0, %v3933_v51  ;;  %v1524_v10 = vpack.c.bf16 %v1372_v58, %v1371_v42  ;;  %v1072_v42 = vld [vmem:[%s4438_s20 + $0x2d8] sm:$0xff] }
 0x12b   : > { %3623 = vmatpush3.bf16.msra.mxu1 %v1537_v13  ;;  %3560 = vmatprep.subr.bf16.mxu0 %v1530_v0  ;;  %v1540_v13 = vpack.c.bf16 %v1404_v20, %v1403_v61  ;;  %v1257_v14 = vmul.bf16 %v4459_v4, %v1041_v57  ;;  %v1263_v15 = vmul.bf16 %v4459_v4, %v1047_v30  ;;  %v1065_v30 = vld [vmem:[%s4438_s20 + $0x2a0] sm:$0xff] }
 0x12c   : > { %3624 = vmatprep.subr.bf16.mxu1 %v1546_v21  ;;  %3940 = vrcp.f32 %v944_v3  ;;  %v1557_v0 = vpack.c.bf16 %v1438_v2, %v1437_v1  ;;  %v1258_v18 = vmul.bf16 %v4475_v9, %v1042_v55  ;;  %v1264_v19 = vmul.bf16 %v4475_v9, %v1048_v6  ;;  %v983_v55 = vld [vmem:[%s4438_s20 + $0x10] sm:$0xff]  ;;  %v984_v3 = vld [vmem:[%s4438_s20 + $0x18] sm:$0xff] }
 0x12d   : > { %v1573_v11 = vpack.c.bf16 %v1470_v8, %v1469_v7  ;;  %v3372_v46 = vcombine.low %v4762_v24, %v4765_v25  ;;  %v3374_v22 = vcombine.low %v4777_v43, %v4780_v44  ;;  %v3385_v23 = vcombine.high %v1257_v14, %v1263_v15  ;;  %v1060_v24 = vld [vmem:[%s4438_s20 + $0x278] sm:$0xff] }
 0x12e   : > { %3561 = vmatpush3.bf16.msra.mxu0 %v1522_v35  ;;  %v3935_v5 = vpop.eup %3934  ;;  %v3387_v33 = vcombine.high %v1258_v18, %v1264_v19  ;;  %v1059_v35 = vld [vmem:[%s4438_s20 + $0x270] sm:$0xff]  ;;  %v1269_v37 = vmul.bf16 %v4459_v4, %v1053_v34  ;;  %v1270_v43 = vmul.bf16 %v4475_v9, %v1054_v17  ;;  %v1276_v44 = vmul.bf16 %v4475_v9, %v1060_v24 }
 0x12f   : > { %3625 = vmatpush3.bf16.msra.mxu1 %v1538_v16  ;;  %3562 = vmatprep.subr.bf16.mxu0 %v1531_v36  ;;  %v977_v28 = vpack.c.bf16 %v3935_v5, %v3935_v5  ;;  %v3937_v39 = vpop.eup %3936  ;;  %v1275_v38 = vmul.bf16 %v4459_v4, %v1059_v35  ;;  %v3384_v49 = vcombine.low %v1257_v14, %v1263_v15  ;;  %v996_v14 = vld [vmem:[%s4438_s20 + $0x78] sm:$0xff]  ;;  %v1002_v15 = vld [vmem:[%s4438_s20 + $0xa8] sm:$0xff]  ;;  %v1471_v35 = vld [vmem:[%s5668_s3 + $0x590] sm:$0xff] }
 0x130   : > { %2118 = vmatmul.mubr.bf16.gmra.mrb[24].mxu0 %v3360_v56  ;;  %3626 = vmatprep.subr.bf16.mxu1 %v1547_v45  ;;  %v978_v21 = vpack.c.bf16 %v3937_v39, %v3937_v39  ;;  %v3386_v51 = vcombine.low %v1258_v18, %v1264_v19  ;;  %v3399_v57 = vcombine.high %v1270_v43, %v1276_v44  ;;  %v1001_v39 = vld [vmem:[%s4438_s20 + $0xa0] sm:$0xff]  ;;  %v1422_v19 = vld [vmem:[%s5668_s3 + $0x408] sm:$0xff] }
 0x131   : > { %2215 = vmatmul.mubr.bf16.gmra.mrb[24].mxu1 %v3362_v48  ;;  %2125 = vmatprep.mubr.bf16.mxu0 %v3373_v26  ;;  %v1134_v12 = vpack.i.b16 %v977_v28, %v977_v28  ;;  %v3397_v52 = vcombine.high %v1269_v37, %v1275_v38  ;;  %v1281_v26 = vmul.bf16 %v4459_v4, %v1065_v30  ;;  %v1421_v18 = vld [vmem:[%s5668_s3 + $0x400] sm:$0xff] }
 0x132   : > { %2222 = vmatprep.mubr.bf16.mxu1 %v3375_v54  ;;  %3563 = vmatpush3.bf16.msra.mxu0 %v1523_v59  ;;  %v1141_v32 = vpack.i.b16 %v978_v21, %v978_v21  ;;  %v1071_v59 = vld [vmem:[%s4438_s20 + $0x2d0] sm:$0xff]  ;;  %v1288_v20 = vmul.bf16 %v4475_v9, %v1072_v42  ;;  %v3396_v54 = vcombine.low %v1269_v37, %v1275_v38  ;;  %v1453_v21 = vld [vmem:[%s5668_s3 + $0x500] sm:$0xff] }
 0x133   : > { %3627 = vmatpush3.bf16.msra.mxu1 %v1539_v60  ;;  %3564 = vmatprep.subr.bf16.mxu0 %v1532_v31  ;;  %v1139_v29 = vrot.slane %v1134_v12, %v4404_v27  ;;  %v1066_v60 = vld [vmem:[%s4438_s20 + $0x2a8] sm:$0xff]  ;;  %v1287_v31 = vmul.bf16 %v4459_v4, %v1071_v59  ;;  %v3398_v1 = vcombine.low %v1270_v43, %v1276_v44  ;;  %v1007_v37 = vld [vmem:[%s4438_s20 + $0xd0] sm:$0xff]  ;;  %v1013_v43 = vld [vmem:[%s4438_s20 + $0x100] sm:$0xff] }
 0x134   : > { %3628 = vmatprep.subr.bf16.mxu1 %v1548_v63  ;;  %v3939_v16 = vpop.eup %3938  ;;  %v1146_v25 = vrot.slane %v1141_v32, %v4404_v27  ;;  %v1282_v61 = vmul.bf16 %v4475_v9, %v1066_v60  ;;  %v989_v63 = vld [vmem:[%s4438_s20 + $0x40] sm:$0xff]  ;;  %v1199_v4 = vmul.bf16 %v4669_v50, %v983_v55  ;;  %v1200_v9 = vmul.bf16 %v4693_v62, %v984_v3  ;;  %v1440_v32 = vld [vmem:[%s5668_s3 + $0x498] sm:$0xff]  ;;  %v1474_v59 = vld [vmem:[%s5668_s3 + $0x5a8] sm:$0xff] }
 0x135   : > { %v979_v36 = vpack.c.bf16 %v3939_v16, %v3939_v16  ;;  %v3409_v2 = vcombine.high %v1281_v26, %v1287_v31  ;;  %v1205_v6 = vmul.bf16 %v4669_v50, %v989_v63  ;;  %v4884_v12 = vmul.bf16 %v4693_v62, %v1002_v15  ;;  %v1472_v16 = vld [vmem:[%s5668_s3 + $0x598] sm:$0xff]  ;;  %v1441_v44 = vld [vmem:[%s5668_s3 + $0x4a0] sm:$0xff] }
 0x136   : > { %3565 = vmatpush3.bf16.msra.mxu0 %v1524_v10  ;;  %v4846_v40 = vcombine.low %v1139_v29, %v1146_v25  ;;  %v3941_v41 = vpop.eup %3940  ;;  %v3411_v5 = vcombine.high %v1282_v61, %v1288_v20  ;;  %v3408_v10 = vcombine.low %v1281_v26, %v1287_v31  ;;  %v3410_v28 = vcombine.low %v1282_v61, %v1288_v20  ;;  %v1439_v29 = vld [vmem:[%s5668_s3 + $0x490] sm:$0xff]  ;;  %v1473_v30 = vld [vmem:[%s5668_s3 + $0x5a0] sm:$0xff]  ;;  %v1426_v61 = vld [vmem:[%s5668_s3 + $0x428] sm:$0xff] }
 0x137   : > { %3629 = vmatpush3.bf16.msra.mxu1 %v1540_v13  ;;  %3678 = vmatprep.subr.bf16.mxu0 %v1557_v0  ;;  %v1148_v45 = vpack.i.b16 %v979_v36, %v979_v36  ;;  %v980_v47 = vpack.c.bf16 %v3941_v41, %v3941_v41  ;;  %v3329_v8 = vcombine.high %v1199_v4, %v1205_v6  ;;  %v995_v0 = vld [vmem:[%s4438_s20 + $0x70] sm:$0xff]  ;;  %v1424_v36 = vld [vmem:[%s5668_s3 + $0x418] sm:$0xff]  ;;  %v1425_v31 = vld [vmem:[%s5668_s3 + $0x420] sm:$0xff] }
 0x138   : > { %2126 = vmatmul.mubr.bf16.gmra.mrb[28].mxu0 %v3372_v46  ;;  %3742 = vmatprep.subr.bf16.mxu1 %v1573_v11  ;;  %v4881_v11 = vmul.bf16 %v4693_v62, %v996_v14  ;;  %v4890_v46 = vmul.bf16 %v4669_v50, %v995_v0  ;;  %v1549_v34 = vpack.c.bf16 %v1422_v19, %v1421_v18  ;;  %v1423_v25 = vld [vmem:[%s5668_s3 + $0x410] sm:$0xff]  ;;  %v1457_v20 = vld [vmem:[%s5668_s3 + $0x520] sm:$0xff]  ;;  %v1444_v3 = vld [vmem:[%s5668_s3 + $0x4b8] sm:$0xff] }
 0x139   : > { %2223 = vmatmul.mubr.bf16.gmra.mrb[28].mxu1 %v3374_v22  ;;  %2133 = vmatprep.mubr.bf16.mxu0 %v3385_v23  ;;  %v1153_v53 = vrot.slane %v1148_v45, %v4404_v27  ;;  %v1155_v56 = vpack.i.b16 %v980_v47, %v980_v47  ;;  %v4893_v22 = vmul.bf16 %v4669_v50, %v1001_v39  ;;  %v1454_v23 = vld [vmem:[%s5668_s3 + $0x508] sm:$0xff]  ;;  %v1428_v15 = vld [vmem:[%s5668_s3 + $0x438] sm:$0xff]  ;;  %v1459_v0 = vld [vmem:[%s5668_s3 + $0x530] sm:$0xff] }
 0x13a   : > { %2230 = vmatprep.mubr.bf16.mxu1 %v3387_v33  ;;  %v3328_v17 = vcombine.low %v1199_v4, %v1205_v6  ;;  %v3343_v24 = vcombine.high %v4881_v11, %v4884_v12  ;;  %v1565_v38 = vpack.c.bf16 %v1454_v23, %v1453_v21  ;;  %v1558_v41 = vpack.c.bf16 %v1440_v32, %v1439_v29  ;;  %v1442_v45 = vld [vmem:[%s5668_s3 + $0x4a8] sm:$0xff]  ;;  %v1460_v39 = vld [vmem:[%s5668_s3 + $0x538] sm:$0xff] }
 0x13b   : > { %v1160_v48 = vrot.slane %v1155_v56, %v4404_v27  ;;  %v990_v27 = vld [vmem:[%s4438_s20 + $0x48] sm:$0xff]  ;;  %v3341_v47 = vcombine.high %v4890_v46, %v4893_v22  ;;  %v1550_v56 = vpack.c.bf16 %v1424_v36, %v1423_v25  ;;  %v1559_v60 = vpack.c.bf16 %v1442_v45, %v1441_v44  ;;  %v1020_v19 = vld [vmem:[%s4438_s20 + $0x138] sm:$0xff]  ;;  %v1479_v44 = vld [vmem:[%s5668_s3 + $0x5d0] sm:$0xff] }
 0x13c   : > { %v1206_v7 = vmul.bf16 %v4693_v62, %v990_v27  ;;  %v4943_v42 = vmul.bf16 %v4669_v50, %v1007_v37  ;;  %v1575_v63 = vpack.c.bf16 %v1474_v59, %v1473_v30  ;;  %v1475_v27 = vld [vmem:[%s5668_s3 + $0x5b0] sm:$0xff]  ;;  %v3340_v4 = vcombine.low %v4890_v46, %v4893_v22  ;;  %v1446_v21 = vld [vmem:[%s5668_s3 + $0x4c8] sm:$0xff]  ;;  %v1477_v22 = vld [vmem:[%s5668_s3 + $0x5c0] sm:$0xff] }
 0x13d   : > { %v4858_v58 = vcombine.low %v1153_v53, %v1160_v48  ;;  %v1456_v53 = vld [vmem:[%s5668_s3 + $0x518] sm:$0xff]  ;;  %v4946_v48 = vmul.bf16 %v4669_v50, %v1013_v43  ;;  %v1551_v6 = vpack.c.bf16 %v1426_v61, %v1425_v31  ;;  %v1026_v46 = vld [vmem:[%s4438_s20 + $0x168] sm:$0xff]  ;;  %v1568_v32 = vpack.c.bf16 %v1460_v39, %v1459_v0  ;;  %v1483_v0 = vld [vmem:[%s5668_s3 + $0x5f0] sm:$0xff] }
 0x13e   : > { %v3331_v13 = vcombine.high %v1200_v9, %v1206_v7  ;;  %v3330_v33 = vcombine.low %v1200_v9, %v1206_v7  ;;  %v1019_v9 = vld [vmem:[%s4438_s20 + $0x130] sm:$0xff]  ;;  %v1025_v7 = vld [vmem:[%s4438_s20 + $0x160] sm:$0xff]  ;;  %v1478_v23 = vld [vmem:[%s5668_s3 + $0x5c8] sm:$0xff]  ;;  %v5033_v36 = vmul.bf16 %v4693_v62, %v1020_v19  ;;  %v5036_v37 = vmul.bf16 %v4693_v62, %v1026_v46 }
 0x13f   : > { %v1462_v25 = vld [vmem:[%s5668_s3 + $0x548] sm:$0xff]  ;;  %v1448_v43 = vld [vmem:[%s5668_s3 + $0x4d8] sm:$0xff]  ;;  %v1043_v46 = vld [vmem:[%s4438_s20 + $0x1f0] sm:$0xff] }
 0x140   : > { %2134 = vmatmul.mubr.bf16.gmra.mrb[32].mxu0 %v3384_v49  ;;  %v1008_v49 = vld [vmem:[%s4438_s20 + $0xd8] sm:$0xff] }
 0x141   : > { %2231 = vmatmul.mubr.bf16.gmra.mrb[32].mxu1 %v3386_v51  ;;  %2141 = vmatprep.mubr.bf16.mxu0 %v3397_v52  ;;  %v1574_v51 = vpack.c.bf16 %v1472_v16, %v1471_v35  ;;  %v1455_v52 = vld [vmem:[%s5668_s3 + $0x510] sm:$0xff]  ;;  %v5021_v35 = vmul.bf16 %v4669_v50, %v1025_v7  ;;  %v1480_v45 = vld [vmem:[%s5668_s3 + $0x5d8] sm:$0xff]  ;;  %v1465_v7 = vld [vmem:[%s5668_s3 + $0x560] sm:$0xff] }
 0x142   : > { %2238 = vmatprep.mubr.bf16.mxu1 %v3399_v57  ;;  %v1014_v57 = vld [vmem:[%s4438_s20 + $0x108] sm:$0xff]  ;;  %v1566_v26 = vpack.c.bf16 %v1456_v53, %v1455_v52  ;;  %v1032_v31 = vld [vmem:[%s4438_s20 + $0x198] sm:$0xff]  ;;  %v1578_v61 = vpack.c.bf16 %v1480_v45, %v1479_v44 }
 0x143   : > { %v4961_v55 = vmul.bf16 %v4693_v62, %v1014_v57  ;;  %v1484_v39 = vld [vmem:[%s5668_s3 + $0x5f8] sm:$0xff] }
 0x148   : > { %2142 = vmatmul.mubr.bf16.gmra.mrb[36].mxu0 %v3396_v54  ;;  %v4958_v54 = vmul.bf16 %v4693_v62, %v1008_v49  ;;  %v1031_v49 = vld [vmem:[%s4438_s20 + $0x190] sm:$0xff] }
 0x149   : > { %2239 = vmatmul.mubr.bf16.gmra.mrb[36].mxu1 %v3398_v1  ;;  %2149 = vmatprep.mubr.bf16.mxu0 %v3409_v2  ;;  %v1458_v1 = vld [vmem:[%s5668_s3 + $0x528] sm:$0xff]  ;;  %v1443_v2 = vld [vmem:[%s5668_s3 + $0x4b0] sm:$0xff] }
 0x14a   : > { %2246 = vmatprep.mubr.bf16.mxu1 %v3411_v5  ;;  %v1476_v5 = vld [vmem:[%s5668_s3 + $0x5b8] sm:$0xff]  ;;  %v1560_v14 = vpack.c.bf16 %v1444_v3, %v1443_v2  ;;  %v3355_v18 = vcombine.high %v4958_v54, %v4961_v55  ;;  %v3354_v57 = vcombine.low %v4958_v54, %v4961_v55  ;;  %v1450_v54 = vld [vmem:[%s5668_s3 + $0x4e8] sm:$0xff] }
 0x14b   : > { %v1038_v55 = vld [vmem:[%s4438_s20 + $0x1c8] sm:$0xff] }
 0x150   : > { %2150 = vmatmul.mubr.bf16.gmra.mrb[40].mxu0 %v3408_v10  ;;  %v3342_v10 = vcombine.low %v4881_v11, %v4884_v12  ;;  %v1576_v11 = vpack.c.bf16 %v1476_v5, %v1475_v27  ;;  %v1445_v12 = vld [vmem:[%s5668_s3 + $0x4c0] sm:$0xff]  ;;  %v1247_v5 = vmul.bf16 %v4669_v50, %v1031_v49 }
 0x151   : > { %2247 = vmatmul.mubr.bf16.gmra.mrb[40].mxu1 %v3410_v28  ;;  %2287 = vmatprep.mubr.bf16.mxu0 %v3329_v8  ;;  %v1427_v8 = vld [vmem:[%s5668_s3 + $0x430] sm:$0xff]  ;;  %v1567_v28 = vpack.c.bf16 %v1458_v1, %v1457_v20  ;;  %v1561_v16 = vpack.c.bf16 %v1446_v21, %v1445_v12  ;;  %v1449_v20 = vld [vmem:[%s5668_s3 + $0x4e0] sm:$0xff]  ;;  %v1482_v1 = vld [vmem:[%s5668_s3 + $0x5e8] sm:$0xff]  ;;  %v3366_v12 = vcombine.low %v5033_v36, %v5036_v37 }
 0x152   : > { %2384 = vmatprep.mubr.bf16.mxu1 %v3331_v13  ;;  %v3353_v13 = vcombine.high %v4943_v42, %v4946_v48  ;;  %v1552_v29 = vpack.c.bf16 %v1428_v15, %v1427_v8  ;;  %v1433_v27 = vld [vmem:[%s5668_s3 + $0x460] sm:$0xff]  ;;  %v1466_v8 = vld [vmem:[%s5668_s3 + $0x568] sm:$0xff]  ;;  %v1452_v15 = vld [vmem:[%s5668_s3 + $0x4f8] sm:$0xff] }
 0x158   : > { %2288 = vmatmul.mubr.bf16.vlgmr.msra.gmra.mrb[44].mxu0 %v3328_v17  ;;  %v1430_v17 = vld [vmem:[%s5668_s3 + $0x448] sm:$0xff] }
 0x159   : > { %2385 = vmatmul.mubr.bf16.vlgmr.msra.gmra.mrb[44].mxu1 %v3330_v33  ;;  %3679 = vmatpush3.bf16.msra.mxu0 %v1549_v34  ;;  %v1429_v33 = vld [vmem:[%s5668_s3 + $0x440] sm:$0xff]  ;;  %v5018_v34 = vmul.bf16 %v4669_v50, %v1019_v9  ;;  %v1434_v9 = vld [vmem:[%s5668_s3 + $0x468] sm:$0xff] }
 0x15a   : > { %2295 = vmatprep.mubr.bf16.mxu0 %v3341_v47  ;;  %2392 = vmatprep.mubr.bf16.mxu1 %v3343_v24  ;;  %v1461_v24 = vld [vmem:[%s5668_s3 + $0x540] sm:$0xff]  ;;  %v3352_v47 = vcombine.low %v4943_v42, %v4946_v48  ;;  %v1553_v52 = vpack.c.bf16 %v1430_v17, %v1429_v33  ;;  %v1463_v42 = vld [vmem:[%s5668_s3 + $0x550] sm:$0xff]  ;;  %v1464_v48 = vld [vmem:[%s5668_s3 + $0x558] sm:$0xff]  ;;  %v1555_v19 = vpack.c.bf16 %v1434_v9, %v1433_v27 }
 0x15b   : > { %3743 = vmatpush3.bf16.msra.mxu1 %v1565_v38  ;;  %3680 = vmatprep.subr.bf16.mxu0 %v1558_v41  ;;  %v1577_v38 = vpack.c.bf16 %v1478_v23, %v1477_v22  ;;  %v1447_v41 = vld [vmem:[%s5668_s3 + $0x4d0] sm:$0xff]  ;;  %v1569_v53 = vpack.c.bf16 %v1462_v25, %v1461_v24  ;;  %v3365_v30 = vcombine.high %v5018_v34, %v5021_v35  ;;  %v1049_v33 = vld [vmem:[%s4438_s20 + $0x220] sm:$0xff]  ;;  %v1044_v17 = vld [vmem:[%s4438_s20 + $0x1f8] sm:$0xff] }
 0x15c   : > { %3744 = vmatprep.subr.bf16.mxu1 %v1574_v51  ;;  %v1037_v51 = vld [vmem:[%s4438_s20 + $0x1c0] sm:$0xff]  ;;  %v1562_v59 = vpack.c.bf16 %v1448_v43, %v1447_v41  ;;  %v1570_v3 = vpack.c.bf16 %v1464_v48, %v1463_v42  ;;  %v1435_v23 = vld [vmem:[%s5668_s3 + $0x470] sm:$0xff]  ;;  %v1050_v24 = vld [vmem:[%s4438_s20 + $0x228] sm:$0xff]  ;;  %v1260_v41 = vmul.bf16 %v4693_v62, %v1044_v17 }
 0x15d   : > { %3681 = vmatpush3.bf16.msra.mxu0 %v1550_v56  ;;  %v1431_v56 = vld [vmem:[%s5668_s3 + $0x450] sm:$0xff]  ;;  %v1266_v43 = vmul.bf16 %v4693_v62, %v1050_v24  ;;  %v1010_v17 = vld [vmem:[%s4438_s20 + $0xe8] sm:$0xff]  ;;  %v1016_v24 = vld [vmem:[%s4438_s20 + $0x118] sm:$0xff] }
 0x15e   : > { %3682 = vmatprep.subr.bf16.mxu0 %v1559_v60  ;;  %v1432_v60 = vld [vmem:[%s5668_s3 + $0x458] sm:$0xff] }
 0x15f   : > { %3745 = vmatpush3.bf16.msra.mxu1 %v1566_v26  ;;  %v3367_v26 = vcombine.high %v5033_v36, %v5036_v37  ;;  %v1554_v2 = vpack.c.bf16 %v1432_v60, %v1431_v56  ;;  %v1259_v36 = vmul.bf16 %v4669_v50, %v1043_v46  ;;  %v1265_v37 = vmul.bf16 %v4669_v50, %v1049_v33  ;;  %v1062_v56 = vld [vmem:[%s4438_s20 + $0x288] sm:$0xff] }
 0x160   : > { %2296 = vmatmul.mubr.bf16.gmra.mrb[48].mxu0 %v3340_v4  ;;  %3746 = vmatprep.subr.bf16.mxu1 %v1575_v63  ;;  %v1481_v63 = vld [vmem:[%s5668_s3 + $0x5e0] sm:$0xff]  ;;  %v1253_v4 = vmul.bf16 %v4669_v50, %v1037_v51  ;;  %v3391_v49 = vcombine.high %v1260_v41, %v1266_v43  ;;  %v1055_v51 = vld [vmem:[%s4438_s20 + $0x250] sm:$0xff]  ;;  %v1278_v60 = vmul.bf16 %v4693_v62, %v1062_v56 }
 0x161   : > { %2393 = vmatmul.mubr.bf16.gmra.mrb[48].mxu1 %v3342_v10  ;;  %2303 = vmatprep.mubr.bf16.mxu0 %v3353_v13  ;;  %v1248_v10 = vmul.bf16 %v4693_v62, %v1032_v31  ;;  %v1254_v13 = vmul.bf16 %v4693_v62, %v1038_v55  ;;  %v3388_v42 = vcombine.low %v1259_v36, %v1265_v37  ;;  %v1074_v55 = vld [vmem:[%s4438_s20 + $0x2e8] sm:$0xff] }
 0x162   : > { %2400 = vmatprep.mubr.bf16.mxu1 %v3355_v18  ;;  %3683 = vmatpush3.bf16.msra.mxu0 %v1551_v6  ;;  %v1563_v6 = vpack.c.bf16 %v1450_v54, %v1449_v20  ;;  %v3364_v18 = vcombine.low %v5018_v34, %v5021_v35  ;;  %v3377_v21 = vcombine.high %v1247_v5, %v1253_v4  ;;  %v1467_v35 = vld [vmem:[%s5668_s3 + $0x570] sm:$0xff]  ;;  %v1073_v20 = vld [vmem:[%s4438_s20 + $0x2e0] sm:$0xff]  ;;  %v1068_v54 = vld [vmem:[%s4438_s20 + $0x2b8] sm:$0xff] }
 0x163   : > { %3747 = vmatpush3.bf16.msra.mxu1 %v1567_v28  ;;  %3684 = vmatprep.subr.bf16.mxu0 %v1560_v14  ;;  %v1579_v28 = vpack.c.bf16 %v1482_v1, %v1481_v63  ;;  %v1451_v14 = vld [vmem:[%s5668_s3 + $0x4f0] sm:$0xff]  ;;  %v1580_v34 = vpack.c.bf16 %v1484_v39, %v1483_v0  ;;  %v3376_v44 = vcombine.low %v1247_v5, %v1253_v4  ;;  %v985_v5 = vld [vmem:[%s4438_s20 + $0x20] sm:$0xff] }
 0x164   : > { %3748 = vmatprep.subr.bf16.mxu1 %v1576_v11  ;;  %v1571_v11 = vpack.c.bf16 %v1466_v8, %v1465_v7  ;;  %v1564_v22 = vpack.c.bf16 %v1452_v15, %v1451_v14  ;;  %v3378_v45 = vcombine.low %v1248_v10, %v1254_v13  ;;  %v3390_v48 = vcombine.low %v1260_v41, %v1266_v43  ;;  %v991_v4 = vld [vmem:[%s4438_s20 + $0x50] sm:$0xff]  ;;  %v986_v7 = vld [vmem:[%s4438_s20 + $0x28] sm:$0xff]  ;;  %v992_v8 = vld [vmem:[%s4438_s20 + $0x58] sm:$0xff] }
 0x165   : > { %v1289_v1 = vmul.bf16 %v4669_v50, %v1073_v20  ;;  %v1040_v20 = vld [vmem:[%s4438_s20 + $0x1d8] sm:$0xff] }
 0x166   : > { %3685 = vmatpush3.bf16.msra.mxu0 %v1552_v29  ;;  %v1436_v29 = vld [vmem:[%s5668_s3 + $0x478] sm:$0xff] }
 0x167   : > { %3749 = vmatpush3.bf16.msra.mxu1 %v1568_v32  ;;  %3686 = vmatprep.subr.bf16.mxu0 %v1561_v16  ;;  %v3379_v32 = vcombine.high %v1248_v10, %v1254_v13  ;;  %v1468_v16 = vld [vmem:[%s5668_s3 + $0x578] sm:$0xff]  ;;  %v1556_v25 = vpack.c.bf16 %v1436_v29, %v1435_v23  ;;  %v1207_v13 = vmul.bf16 %v4846_v40, %v991_v4  ;;  %v1045_v4 = vld [vmem:[%s4438_s20 + $0x200] sm:$0xff] }
 0x168   : > { %2304 = vmatmul.mubr.bf16.gmra.mrb[52].mxu0 %v3352_v47  ;;  %3750 = vmatprep.subr.bf16.mxu1 %v1577_v38  ;;  %v1572_v38 = vpack.c.bf16 %v1468_v16, %v1467_v35  ;;  %v3389_v47 = vcombine.high %v1259_v36, %v1265_v37  ;;  %v1009_v35 = vld [vmem:[%s4438_s20 + $0xe0] sm:$0xff]  ;;  %v1015_v16 = vld [vmem:[%s4438_s20 + $0x110] sm:$0xff]  ;;  %v1226_v37 = vmul.bf16 %v4858_v58, %v1010_v17 }
 0x169   : > { %2401 = vmatmul.mubr.bf16.gmra.mrb[52].mxu1 %v3354_v57  ;;  %2311 = vmatprep.mubr.bf16.mxu0 %v3365_v30  ;;  %v1271_v57 = vmul.bf16 %v4669_v50, %v1055_v51  ;;  %v1231_v36 = vmul.bf16 %v4846_v40, %v1015_v16  ;;  %v1022_v51 = vld [vmem:[%s4438_s20 + $0x148] sm:$0xff]  ;;  %v1076_v16 = vld [vmem:[%s4438_s20 + $0x2f8] sm:$0xff] }
 0x16a   : > { %2408 = vmatprep.mubr.bf16.mxu1 %v3367_v26  ;;  %3687 = vmatpush3.bf16.msra.mxu0 %v1553_v52  ;;  %v1061_v52 = vld [vmem:[%s4438_s20 + $0x280] sm:$0xff] }
 0x16b   : > { %3751 = vmatpush3.bf16.msra.mxu1 %v1569_v53  ;;  %3688 = vmatprep.subr.bf16.mxu0 %v1562_v59  ;;  %v1056_v53 = vld [vmem:[%s4438_s20 + $0x258] sm:$0xff]  ;;  %v1277_v30 = vmul.bf16 %v4669_v50, %v1061_v52 }
 0x16c   : > { %3752 = vmatprep.subr.bf16.mxu1 %v1578_v61  ;;  %v1272_v59 = vmul.bf16 %v4693_v62, %v1056_v53  ;;  %v1067_v61 = vld [vmem:[%s4438_s20 + $0x2b0] sm:$0xff]  ;;  %v1028_v52 = vld [vmem:[%s4438_s20 + $0x178] sm:$0xff] }
 0x16d   : > { %v3401_v26 = vcombine.high %v1271_v57, %v1277_v30  ;;  %v1283_v63 = vmul.bf16 %v4669_v50, %v1067_v61  ;;  %v3400_v27 = vcombine.low %v1271_v57, %v1277_v30  ;;  %v1201_v50 = vmul.bf16 %v4846_v40, %v985_v5  ;;  %v1034_v61 = vld [vmem:[%s4438_s20 + $0x1a8] sm:$0xff] }
 0x16e   : > { %3689 = vmatpush3.bf16.msra.mxu0 %v1554_v2  ;;  %v3403_v31 = vcombine.high %v1272_v59, %v1278_v60  ;;  %v1284_v2 = vmul.bf16 %v4693_v62, %v1068_v54  ;;  %v1238_v57 = vmul.bf16 %v4858_v58, %v1022_v51  ;;  %v1244_v30 = vmul.bf16 %v4858_v58, %v1028_v52 }
 0x16f   : > { %3753 = vmatpush3.bf16.msra.mxu1 %v1570_v3  ;;  %3690 = vmatprep.subr.bf16.mxu0 %v1563_v6  ;;  %v1290_v3 = vmul.bf16 %v4693_v62, %v1074_v55  ;;  %v3402_v6 = vcombine.low %v1272_v59, %v1278_v60  ;;  %v3413_v9 = vcombine.high %v1283_v63, %v1289_v1 }
 0x170   : > { %2312 = vmatmul.mubr.bf16.gmra.mrb[56].mxu0 %v3364_v18  ;;  %3754 = vmatprep.subr.bf16.mxu1 %v1579_v28  ;;  %v1202_v62 = vmul.bf16 %v4858_v58, %v986_v7  ;;  %v1208_v28 = vmul.bf16 %v4858_v58, %v992_v8  ;;  %v3333_v14 = vcombine.high %v1201_v50, %v1207_v13  ;;  %v998_v18 = vld [vmem:[%s4438_s20 + $0x88] sm:$0xff]  ;;  %v1052_v7 = vld [vmem:[%s4438_s20 + $0x238] sm:$0xff] }
 0x171   : > { %2409 = vmatmul.mubr.bf16.gmra.mrb[56].mxu1 %v3366_v12  ;;  %2319 = vmatprep.mubr.bf16.mxu0 %v3377_v21  ;;  %v3415_v10 = vcombine.high %v1284_v2, %v1290_v3  ;;  %v3412_v15 = vcombine.low %v1283_v63, %v1289_v1  ;;  %v3414_v39 = vcombine.low %v1284_v2, %v1290_v3  ;;  %v1003_v12 = vld [vmem:[%s4438_s20 + $0xb0] sm:$0xff] }
 0x172   : > { %2416 = vmatprep.mubr.bf16.mxu1 %v3379_v32  ;;  %3691 = vmatpush3.bf16.msra.mxu0 %v1555_v19  ;;  %v3335_v0 = vcombine.high %v1202_v62, %v1208_v28  ;;  %v1004_v19 = vld [vmem:[%s4438_s20 + $0xb8] sm:$0xff]  ;;  %v1214_v21 = vmul.bf16 %v4858_v58, %v998_v18  ;;  %v1219_v23 = vmul.bf16 %v4846_v40, %v1003_v12  ;;  %v1058_v18 = vld [vmem:[%s4438_s20 + $0x268] sm:$0xff] }
 0x173   : > { %3755 = vmatpush3.bf16.msra.mxu1 %v1571_v11  ;;  %3692 = vmatprep.subr.bf16.mxu0 %v1564_v22  ;;  %v997_v11 = vld [vmem:[%s4438_s20 + $0x80] sm:$0xff]  ;;  %v1220_v46 = vmul.bf16 %v4858_v58, %v1004_v19  ;;  %v3334_v29 = vcombine.low %v1202_v62, %v1208_v28  ;;  %v3332_v32 = vcombine.low %v1201_v50, %v1207_v13  ;;  %v1064_v19 = vld [vmem:[%s4438_s20 + $0x298] sm:$0xff] }
 0x174   : > { %3756 = vmatprep.subr.bf16.mxu1 %v1580_v34  ;;  %v1213_v22 = vmul.bf16 %v4846_v40, %v997_v11  ;;  %v1250_v63 = vmul.bf16 %v4858_v58, %v1034_v61  ;;  %v1256_v1 = vmul.bf16 %v4858_v58, %v1040_v20  ;;  %v3370_v3 = vcombine.low %v1238_v57, %v1244_v30 }
 0x175   : > { %v3347_v33 = vcombine.high %v1214_v21, %v1220_v46  ;;  %v3346_v43 = vcombine.low %v1214_v21, %v1220_v46  ;;  %v1261_v8 = vmul.bf16 %v4846_v40, %v1045_v4  ;;  %v1268_v13 = vmul.bf16 %v4858_v58, %v1052_v7 }
 0x176   : > { %3693 = vmatpush3.bf16.msra.mxu0 %v1556_v25  ;;  %v3345_v34 = vcombine.high %v1213_v22, %v1219_v23  ;;  %v1225_v25 = vmul.bf16 %v4846_v40, %v1009_v35  ;;  %v3344_v41 = vcombine.low %v1213_v22, %v1219_v23  ;;  %v3383_v5 = vcombine.high %v1250_v63, %v1256_v1  ;;  %v1070_v35 = vld [vmem:[%s4438_s20 + $0x2c8] sm:$0xff] }
 0x177   : > { %3757 = vmatpush3.bf16.msra.mxu1 %v1572_v38  ;;  %v1232_v38 = vmul.bf16 %v4858_v58, %v1016_v24  ;;  %v3382_v28 = vcombine.low %v1250_v63, %v1256_v1  ;;  %v1274_v21 = vmul.bf16 %v4858_v58, %v1058_v18  ;;  %v1280_v46 = vmul.bf16 %v4858_v58, %v1064_v19 }
 0x178   : > { %2320 = vmatmul.mubr.bf16.gmra.mrb[60].mxu0 %v3376_v44  ;;  %v3357_v44 = vcombine.high %v1225_v25, %v1231_v36  ;;  %v3356_v59 = vcombine.low %v1225_v25, %v1231_v36  ;;  %v1286_v25 = vmul.bf16 %v4858_v58, %v1070_v35  ;;  %v1292_v36 = vmul.bf16 %v4858_v58, %v1076_v16 }
 0x179   : > { %2417 = vmatmul.mubr.bf16.gmra.mrb[60].mxu1 %v3378_v45  ;;  %2327 = vmatprep.mubr.bf16.mxu0 %v3389_v47  ;;  %v3359_v45 = vcombine.high %v1226_v37, %v1232_v38  ;;  %v1021_v47 = vld [vmem:[%s4438_s20 + $0x140] sm:$0xff]  ;;  %v3358_v60 = vcombine.low %v1226_v37, %v1232_v38  ;;  %v3406_v38 = vcombine.low %v1274_v21, %v1280_v46 }
 0x17a   : > { %2424 = vmatprep.mubr.bf16.mxu1 %v3391_v49  ;;  %v1027_v49 = vld [vmem:[%s4438_s20 + $0x170] sm:$0xff]  ;;  %v1237_v53 = vmul.bf16 %v4846_v40, %v1021_v47 }
 0x17b   : > { %v1243_v56 = vmul.bf16 %v4846_v40, %v1027_v49 }
 0x17d   : > { %v3368_v2 = vcombine.low %v1237_v53, %v1243_v56 }
 0x180   : > { %2328 = vmatmul.mubr.bf16.gmra.mrb[64].mxu0 %v3388_v42  ;;  %v3369_v42 = vcombine.high %v1237_v53, %v1243_v56 }
 0x181   : > { %2425 = vmatmul.mubr.bf16.gmra.mrb[64].mxu1 %v3390_v48  ;;  %2335 = vmatprep.mubr.bf16.mxu0 %v3401_v26  ;;  %v3371_v48 = vcombine.high %v1238_v57, %v1244_v30  ;;  %v1033_v26 = vld [vmem:[%s4438_s20 + $0x1a0] sm:$0xff] }
 0x182   : > { %2432 = vmatprep.mubr.bf16.mxu1 %v3403_v31  ;;  %v1039_v31 = vld [vmem:[%s4438_s20 + $0x1d0] sm:$0xff]  ;;  %v1249_v54 = vmul.bf16 %v4846_v40, %v1033_v26 }
 0x183   : > { %v1255_v55 = vmul.bf16 %v4846_v40, %v1039_v31 }
 0x185   : > { %v3380_v62 = vcombine.low %v1249_v54, %v1255_v55 }
 0x188   : > { %2336 = vmatmul.mubr.bf16.gmra.mrb[68].mxu0 %v3400_v27  ;;  %v3381_v27 = vcombine.high %v1249_v54, %v1255_v55 }
 0x189   : > { %2433 = vmatmul.mubr.bf16.gmra.mrb[68].mxu1 %v3402_v6  ;;  %2343 = vmatprep.mubr.bf16.mxu0 %v3413_v9  ;;  %v1051_v6 = vld [vmem:[%s4438_s20 + $0x230] sm:$0xff]  ;;  %v1046_v9 = vld [vmem:[%s4438_s20 + $0x208] sm:$0xff] }
 0x18a   : > { %2440 = vmatprep.mubr.bf16.mxu1 %v3415_v10  ;;  %v1267_v10 = vmul.bf16 %v4846_v40, %v1051_v6  ;;  %v1262_v50 = vmul.bf16 %v4858_v58, %v1046_v9 }
 0x18c   : > { %v3392_v22 = vcombine.low %v1261_v8, %v1267_v10  ;;  %v3394_v23 = vcombine.low %v1262_v50, %v1268_v13 }
 0x190   : > { %2344 = vmatmul.mubr.bf16.gmra.mrb[72].mxu0 %v3412_v15  ;;  %v3395_v15 = vcombine.high %v1262_v50, %v1268_v13 }
 0x191   : > { %2441 = vmatmul.mubr.bf16.gmra.mrb[72].mxu1 %v3414_v39  ;;  %2481 = vmatprep.mubr.bf16.mxu0 %v3333_v14  ;;  %v3393_v14 = vcombine.high %v1261_v8, %v1267_v10  ;;  %v1063_v39 = vld [vmem:[%s4438_s20 + $0x290] sm:$0xff] }
 0x192   : > { %2578 = vmatprep.mubr.bf16.mxu1 %v3335_v0  ;;  %v1057_v0 = vld [vmem:[%s4438_s20 + $0x260] sm:$0xff]  ;;  %v1279_v12 = vmul.bf16 %v4846_v40, %v1063_v39 }
 0x193   : > { %v1273_v11 = vmul.bf16 %v4846_v40, %v1057_v0 }
 0x195   : > { %v3404_v37 = vcombine.low %v1273_v11, %v1279_v12 }
 0x198   : > { %2482 = vmatmul.mubr.bf16.vlgmr.msra.gmra.mrb[76].mxu0 %v3332_v32  ;;  %v3407_v32 = vcombine.high %v1274_v21, %v1280_v46 }
 0x199   : > { %2579 = vmatmul.mubr.bf16.vlgmr.msra.gmra.mrb[76].mxu1 %v3334_v29  ;;  %2489 = vmatprep.mubr.bf16.mxu0 %v3345_v34  ;;  %v3405_v29 = vcombine.high %v1273_v11, %v1279_v12  ;;  %v1075_v34 = vld [vmem:[%s4438_s20 + $0x2f0] sm:$0xff] }
 0x19a   : > { %2586 = vmatprep.mubr.bf16.mxu1 %v3347_v33  ;;  %v1069_v33 = vld [vmem:[%s4438_s20 + $0x2c0] sm:$0xff]  ;;  %v1291_v24 = vmul.bf16 %v4846_v40, %v1075_v34  ;;  %s3249_s20 = sshll.u32 %s5673_s15, 3 }
 0x19b   : > { %v1285_v17 = vmul.bf16 %v4846_v40, %v1069_v33  ;;  %s5464_s18 = scalar_lea.vmem %s5670_s5, %s3249_s20  ;;  %s5611_s25 = scalar_lea.vmem %s5671_s6, %s3249_s20 }
 0x1a0   : > { %2490 = vmatmul.mubr.bf16.gmra.mrb[80].mxu0 %v3344_v41  ;;  %v3417_v41 = vcombine.high %v1285_v17, %v1291_v24 }
 0x1a1   : > { %2587 = vmatmul.mubr.bf16.gmra.mrb[80].mxu1 %v3346_v43  ;;  %2497 = vmatprep.mubr.bf16.mxu0 %v3357_v44  ;;  %v3419_v43 = vcombine.high %v1286_v25, %v1292_v36  ;;  %v3416_v44 = vcombine.low %v1285_v17, %v1291_v24 }
 0x1a2   : > { %2594 = vmatprep.mubr.bf16.mxu1 %v3359_v45  ;;  %v3418_v45 = vcombine.low %v1286_v25, %v1292_v36 }
 0x1a8   : > { %2498 = vmatmul.mubr.bf16.gmra.mrb[84].mxu0 %v3356_v59 }
 0x1a9   : > { %2595 = vmatmul.mubr.bf16.gmra.mrb[84].mxu1 %v3358_v60  ;;  %2505 = vmatprep.mubr.bf16.mxu0 %v3369_v42 }
 0x1aa   : > { %2602 = vmatprep.mubr.bf16.mxu1 %v3371_v48 }
 0x1b0   : > { %2506 = vmatmul.mubr.bf16.gmra.mrb[88].mxu0 %v3368_v2 }
 0x1b1   : > { %2603 = vmatmul.mubr.bf16.gmra.mrb[88].mxu1 %v3370_v3  ;;  %2513 = vmatprep.mubr.bf16.mxu0 %v3381_v27 }
 0x1b2   : > { %2610 = vmatprep.mubr.bf16.mxu1 %v3383_v5 }
 0x1b8   : > { %2514 = vmatmul.mubr.bf16.gmra.mrb[92].mxu0 %v3380_v62 }
 0x1b9   : > { %2611 = vmatmul.mubr.bf16.gmra.mrb[92].mxu1 %v3382_v28  ;;  %2521 = vmatprep.mubr.bf16.mxu0 %v3393_v14 }
 0x1ba   : > { %2618 = vmatprep.mubr.bf16.mxu1 %v3395_v15 }
 0x1c0   : > { %2522 = vmatmul.mubr.bf16.gmra.mrb[96].mxu0 %v3392_v22 }
 0x1c1   : > { %2619 = vmatmul.mubr.bf16.gmra.mrb[96].mxu1 %v3394_v23  ;;  %2529 = vmatprep.mubr.bf16.mxu0 %v3405_v29 }
 0x1c2   : > { %2626 = vmatprep.mubr.bf16.mxu1 %v3407_v32 }
 0x1c8   : > { %2530 = vmatmul.mubr.bf16.gmra.mrb[100].mxu0 %v3404_v37 }
 0x1c9   : > { %2627 = vmatmul.mubr.bf16.gmra.mrb[100].mxu1 %v3406_v38  ;;  %2537 = vmatprep.mubr.bf16.mxu0 %v3417_v41 }
 0x1ca   : > { %2634 = vmatprep.mubr.bf16.mxu1 %v3419_v43 }
 0x1d0   : > { %2538 = vmatmul.mubr.bf16.gmra.mrb[104].mxu0 %v3416_v44 }
 0x1d1   : > { %2635 = vmatmul.mubr.bf16.gmra.mrb[104].mxu1 %v3418_v45 }
 0x1eb   : > { %v3438_v47 = vpop.f32.mrb[12].mxu0 }
 0x1ec   : > { %v3502_v49 = vpop.f32.mrb[12].mxu1  ;;  %v3439_v51 = vpop.f32.mrb[13].mxu0 }
 0x1ed   : > { %v3440_v40 = vadd.f32 %v3439_v51, %v3438_v47  ;;  %v3503_v52 = vpop.f32.mrb[13].mxu1  ;;  %v3441_v53 = vpop.f32.mrb[14].mxu0 }
 0x1ee   : > { %v3504_v56 = vadd.f32 %v3503_v52, %v3502_v49  ;;  %v3505_v58 = vpop.f32.mrb[14].mxu1  ;;  %v3442_v57 = vpop.f32.mrb[15].mxu0 }
 0x1ef   : > { %v3443_v30 = vadd.f32 %v3442_v57, %v3441_v53  ;;  %v3506_v59 = vpop.f32.mrb[15].mxu1 }
 0x1f0   : > { %v5218_v60 = vadd.f32 %v3504_v56, %v3440_v40  ;;  %v3507_v42 = vadd.f32 %v3506_v59, %v3505_v58 }
 0x1f2   : > { %v5220_v48 = vadd.f32 %v3507_v42, %v3443_v30 }
 0x1f3   : > { %v3444_v26 = vpop.f32.mrb[16].mxu0 }
 0x1f4   : > { %v3508_v31 = vpop.f32.mrb[16].mxu1  ;;  %v3445_v61 = vpop.f32.mrb[17].mxu0 }
 0x1f5   : > { %v3446_v20 = vadd.f32 %v3445_v61, %v3444_v26  ;;  %v3509_v54 = vpop.f32.mrb[17].mxu1  ;;  %v3447_v55 = vpop.f32.mrb[18].mxu0 }
 0x1f6   : > { %v3510_v63 = vadd.f32 %v3509_v54, %v3508_v31  ;;  %v3511_v1 = vpop.f32.mrb[18].mxu1  ;;  %v3448_v2 = vpop.f32.mrb[19].mxu0 }
 0x1f7   : > { %v3449_v3 = vadd.f32 %v3448_v2, %v3447_v55  ;;  %v3512_v27 = vpop.f32.mrb[19].mxu1 }
 0x1f8   : > { %v5222_v5 = vadd.f32 %v3510_v63, %v3446_v20  ;;  %v3513_v4 = vadd.f32 %v3512_v27, %v3511_v1 }
 0x1fa   : > { %v5224_v6 = vadd.f32 %v3513_v4, %v3449_v3 }
 0x1fb   : > { %v3450_v9 = vpop.f32.mrb[20].mxu0 }
 0x1fc   : > { %v3514_v7 = vpop.f32.mrb[20].mxu1  ;;  %v3451_v8 = vpop.f32.mrb[21].mxu0 }
 0x1fd   : > { %v3452_v10 = vadd.f32 %v3451_v8, %v3450_v9  ;;  %v3515_v50 = vpop.f32.mrb[21].mxu1  ;;  %v3453_v13 = vpop.f32.mrb[22].mxu0 }
 0x1fe   : > { %v3516_v62 = vadd.f32 %v3515_v50, %v3514_v7  ;;  %v3517_v28 = vpop.f32.mrb[22].mxu1  ;;  %v3454_v14 = vpop.f32.mrb[23].mxu0 }
 0x1ff   : > { %v3455_v15 = vadd.f32 %v3454_v14, %v3453_v13  ;;  %v3518_v0 = vpop.f32.mrb[23].mxu1 }
 0x200   : > { %v5226_v39 = vadd.f32 %v3516_v62, %v3452_v10  ;;  %v3519_v18 = vadd.f32 %v3518_v0, %v3517_v28 }
 0x202   : > { %v5228_v19 = vadd.f32 %v3519_v18, %v3455_v15 }
 0x203   : > { %v3456_v11 = vpop.f32.mrb[24].mxu0 }
 0x204   : > { %v3520_v12 = vpop.f32.mrb[24].mxu1  ;;  %v3457_v21 = vpop.f32.mrb[25].mxu0 }
 0x205   : > { %v3458_v46 = vadd.f32 %v3457_v21, %v3456_v11  ;;  %v3521_v22 = vpop.f32.mrb[25].mxu1  ;;  %v3459_v23 = vpop.f32.mrb[26].mxu0 }
 0x206   : > { %v3522_v29 = vadd.f32 %v3521_v22, %v3520_v12  ;;  %v3523_v32 = vpop.f32.mrb[26].mxu1  ;;  %v3460_v33 = vpop.f32.mrb[27].mxu0 }
 0x207   : > { %v3461_v34 = vadd.f32 %v3460_v33, %v3459_v23  ;;  %v3524_v35 = vpop.f32.mrb[27].mxu1 }
 0x208   : > { %v5230_v16 = vadd.f32 %v3522_v29, %v3458_v46  ;;  %v3525_v17 = vadd.f32 %v3524_v35, %v3523_v32 }
 0x20a   : > { %v5232_v24 = vadd.f32 %v3525_v17, %v3461_v34 }
 0x20b   : > { %v3462_v25 = vpop.f32.mrb[28].mxu0 }
 0x20c   : > { %v3526_v36 = vpop.f32.mrb[28].mxu1  ;;  %v3463_v37 = vpop.f32.mrb[29].mxu0 }
 0x20d   : > { %v3464_v38 = vadd.f32 %v3463_v37, %v3462_v25  ;;  %v3527_v41 = vpop.f32.mrb[29].mxu1  ;;  %v3465_v43 = vpop.f32.mrb[30].mxu0 }
 0x20e   : > { %v3528_v44 = vadd.f32 %v3527_v41, %v3526_v36  ;;  %v3529_v45 = vpop.f32.mrb[30].mxu1  ;;  %v3466_v47 = vpop.f32.mrb[31].mxu0 }
 0x20f   : > { %v3467_v49 = vadd.f32 %v3466_v47, %v3465_v43  ;;  %v3530_v51 = vpop.f32.mrb[31].mxu1 }
 0x210   : > { %v5234_v40 = vadd.f32 %v3528_v44, %v3464_v38  ;;  %v3531_v52 = vadd.f32 %v3530_v51, %v3529_v45 }
 0x212   : > { %v5236_v53 = vadd.f32 %v3531_v52, %v3467_v49 }
 0x213   : > { %v3468_v56 = vpop.f32.mrb[32].mxu0 }
 0x214   : > { %v3532_v58 = vpop.f32.mrb[32].mxu1  ;;  %v3469_v57 = vpop.f32.mrb[33].mxu0 }
 0x215   : > { %v3470_v30 = vadd.f32 %v3469_v57, %v3468_v56  ;;  %v3533_v59 = vpop.f32.mrb[33].mxu1  ;;  %v3471_v42 = vpop.f32.mrb[34].mxu0 }
 0x216   : > { %v3534_v26 = vadd.f32 %v3533_v59, %v3532_v58  ;;  %v3535_v31 = vpop.f32.mrb[34].mxu1  ;;  %v3472_v61 = vpop.f32.mrb[35].mxu0 }
 0x217   : > { %v3473_v20 = vadd.f32 %v3472_v61, %v3471_v42  ;;  %v3536_v54 = vpop.f32.mrb[35].mxu1 }
 0x218   : > { %v5238_v55 = vadd.f32 %v3534_v26, %v3470_v30  ;;  %v3537_v63 = vadd.f32 %v3536_v54, %v3535_v31 }
 0x21a   : > { %v5240_v1 = vadd.f32 %v3537_v63, %v3473_v20 }
 0x21b   : > { %v3474_v2 = vpop.f32.mrb[36].mxu0 }
 0x21c   : > { %v3538_v3 = vpop.f32.mrb[36].mxu1  ;;  %v3475_v27 = vpop.f32.mrb[37].mxu0 }
 0x21d   : > { %v3476_v4 = vadd.f32 %v3475_v27, %v3474_v2  ;;  %v3539_v9 = vpop.f32.mrb[37].mxu1  ;;  %v3477_v7 = vpop.f32.mrb[38].mxu0 }
 0x21e   : > { %v3540_v8 = vadd.f32 %v3539_v9, %v3538_v3  ;;  %v3541_v10 = vpop.f32.mrb[38].mxu1  ;;  %v3478_v50 = vpop.f32.mrb[39].mxu0 }
 0x21f   : > { %v3479_v13 = vadd.f32 %v3478_v50, %v3477_v7  ;;  %v3542_v62 = vpop.f32.mrb[39].mxu1 }
 0x220   : > { %v5242_v28 = vadd.f32 %v3540_v8, %v3476_v4  ;;  %v3543_v14 = vadd.f32 %v3542_v62, %v3541_v10 }
 0x222   : > { %v5244_v15 = vadd.f32 %v3543_v14, %v3479_v13 }
 0x223   : > { %v3480_v0 = vpop.f32.mrb[40].mxu0 }
 0x224   : > { %v3544_v18 = vpop.f32.mrb[40].mxu1  ;;  %v3481_v11 = vpop.f32.mrb[41].mxu0 }
 0x225   : > { %v3482_v12 = vadd.f32 %v3481_v11, %v3480_v0  ;;  %v3545_v21 = vpop.f32.mrb[41].mxu1  ;;  %v3483_v46 = vpop.f32.mrb[42].mxu0 }
 0x226   : > { %v3546_v22 = vadd.f32 %v3545_v21, %v3544_v18  ;;  %v3547_v23 = vpop.f32.mrb[42].mxu1  ;;  %v3484_v29 = vpop.f32.mrb[43].mxu0 }
 0x227   : > { %v3485_v32 = vadd.f32 %v3484_v29, %v3483_v46  ;;  %v3548_v33 = vpop.f32.mrb[43].mxu1 }
 0x228   : > { %v5246_v34 = vadd.f32 %v3546_v22, %v3482_v12  ;;  %v3549_v35 = vadd.f32 %v3548_v33, %v3547_v23 }
 0x22a   : > { %v5248_v17 = vadd.f32 %v3549_v35, %v3485_v32 }
 0x22b   : > { %v3566_v25 = vpop.f32.mrb[44].mxu0 }
 0x22c   : > { %v3630_v36 = vpop.f32.mrb[44].mxu1  ;;  %v3567_v37 = vpop.f32.mrb[45].mxu0 }
 0x22d   : > { %v3568_v38 = vadd.f32 %v3567_v37, %v3566_v25  ;;  %v3631_v41 = vpop.f32.mrb[45].mxu1  ;;  %v3569_v43 = vpop.f32.mrb[46].mxu0 }
 0x22e   : > { %v3632_v44 = vadd.f32 %v3631_v41, %v3630_v36  ;;  %v3633_v45 = vpop.f32.mrb[46].mxu1  ;;  %v3570_v47 = vpop.f32.mrb[47].mxu0 }
 0x22f   : > { %v2290_v49 = vadd.f32 %v3568_v38, %v5218_v60  ;;  %v3571_v51 = vadd.f32 %v3570_v47, %v3569_v43  ;;  %v3634_v52 = vpop.f32.mrb[47].mxu1 }
 0x230   : > { %v3635_v56 = vadd.f32 %v3634_v52, %v3633_v45 }
 0x231   : > { %v5251_v58 = vadd.f32 %v3632_v44, %v2290_v49  ;;  %v2293_v57 = vadd.f32 %v3571_v51, %v5220_v48 }
 0x233   : > { %v5254_v30 = vadd.f32 %v3635_v56, %v2293_v57  ;;  %v3572_v59 = vpop.f32.mrb[48].mxu0 }
 0x234   : > { %v3636_v42 = vpop.f32.mrb[48].mxu1  ;;  %v3573_v26 = vpop.f32.mrb[49].mxu0 }
 0x235   : > { %v3574_v31 = vadd.f32 %v3573_v26, %v3572_v59  ;;  %v3637_v61 = vpop.f32.mrb[49].mxu1  ;;  %v3575_v20 = vpop.f32.mrb[50].mxu0 }
 0x236   : > { %v3638_v54 = vadd.f32 %v3637_v61, %v3636_v42  ;;  %v3639_v63 = vpop.f32.mrb[50].mxu1  ;;  %v3576_v2 = vpop.f32.mrb[51].mxu0 }
 0x237   : > { %v2298_v60 = vadd.f32 %v3574_v31, %v5222_v5  ;;  %v3577_v3 = vadd.f32 %v3576_v2, %v3575_v20  ;;  %v3640_v27 = vpop.f32.mrb[51].mxu1 }
 0x238   : > { %v3641_v4 = vadd.f32 %v3640_v27, %v3639_v63 }
 0x239   : > { %v5257_v9 = vadd.f32 %v3638_v54, %v2298_v60  ;;  %v2301_v48 = vadd.f32 %v3577_v3, %v5224_v6 }
 0x23b   : > { %v5260_v7 = vadd.f32 %v3641_v4, %v2301_v48  ;;  %v3578_v8 = vpop.f32.mrb[52].mxu0 }
 0x23c   : > { %v3642_v10 = vpop.f32.mrb[52].mxu1  ;;  %v3579_v50 = vpop.f32.mrb[53].mxu0 }
 0x23d   : > { %v3580_v13 = vadd.f32 %v3579_v50, %v3578_v8  ;;  %v3643_v62 = vpop.f32.mrb[53].mxu1  ;;  %v3581_v14 = vpop.f32.mrb[54].mxu0 }
 0x23e   : > { %v3644_v0 = vadd.f32 %v3643_v62, %v3642_v10  ;;  %v3645_v18 = vpop.f32.mrb[54].mxu1  ;;  %v3582_v11 = vpop.f32.mrb[55].mxu0 }
 0x23f   : > { %v2306_v5 = vadd.f32 %v3580_v13, %v5226_v39  ;;  %v3583_v12 = vadd.f32 %v3582_v11, %v3581_v14  ;;  %v3646_v21 = vpop.f32.mrb[55].mxu1 }
 0x240   : > { %v3647_v46 = vadd.f32 %v3646_v21, %v3645_v18 }
 0x241   : > { %v5263_v22 = vadd.f32 %v3644_v0, %v2306_v5  ;;  %v2309_v6 = vadd.f32 %v3583_v12, %v5228_v19 }
 0x243   : > { %v5266_v23 = vadd.f32 %v3647_v46, %v2309_v6  ;;  %v3584_v29 = vpop.f32.mrb[56].mxu0 }
 0x244   : > { %v3648_v32 = vpop.f32.mrb[56].mxu1  ;;  %v3585_v33 = vpop.f32.mrb[57].mxu0 }
 0x245   : > { %v3586_v35 = vadd.f32 %v3585_v33, %v3584_v29  ;;  %v3649_v25 = vpop.f32.mrb[57].mxu1  ;;  %v3587_v36 = vpop.f32.mrb[58].mxu0 }
 0x246   : > { %v3650_v37 = vadd.f32 %v3649_v25, %v3648_v32  ;;  %v3651_v38 = vpop.f32.mrb[58].mxu1  ;;  %v3588_v41 = vpop.f32.mrb[59].mxu0 }
 0x247   : > { %v2314_v39 = vadd.f32 %v3586_v35, %v5230_v16  ;;  %v3589_v43 = vadd.f32 %v3588_v41, %v3587_v36  ;;  %v3652_v44 = vpop.f32.mrb[59].mxu1 }
 0x248   : > { %v3653_v45 = vadd.f32 %v3652_v44, %v3651_v38 }
 0x249   : > { %v5269_v47 = vadd.f32 %v3650_v37, %v2314_v39  ;;  %v2317_v19 = vadd.f32 %v3589_v43, %v5232_v24 }
 0x24b   : > { %v5272_v49 = vadd.f32 %v3653_v45, %v2317_v19  ;;  %v3590_v51 = vpop.f32.mrb[60].mxu0 }
 0x24c   : > { %v3654_v52 = vpop.f32.mrb[60].mxu1  ;;  %v3591_v56 = vpop.f32.mrb[61].mxu0 }
 0x24d   : > { %v3592_v57 = vadd.f32 %v3591_v56, %v3590_v51  ;;  %v3655_v59 = vpop.f32.mrb[61].mxu1  ;;  %v3593_v42 = vpop.f32.mrb[62].mxu0 }
 0x24e   : > { %v3656_v26 = vadd.f32 %v3655_v59, %v3654_v52  ;;  %v3657_v31 = vpop.f32.mrb[62].mxu1  ;;  %v3594_v61 = vpop.f32.mrb[63].mxu0 }
 0x24f   : > { %v2322_v16 = vadd.f32 %v3592_v57, %v5234_v40  ;;  %v3595_v20 = vadd.f32 %v3594_v61, %v3593_v42  ;;  %v3658_v54 = vpop.f32.mrb[63].mxu1 }
 0x250   : > { %v3659_v63 = vadd.f32 %v3658_v54, %v3657_v31 }
 0x251   : > { %v5275_v2 = vadd.f32 %v3656_v26, %v2322_v16  ;;  %v2325_v24 = vadd.f32 %v3595_v20, %v5236_v53 }
 0x253   : > { %v5278_v60 = vadd.f32 %v3659_v63, %v2325_v24  ;;  %v3596_v3 = vpop.f32.mrb[64].mxu0 }
 0x254   : > { %v3660_v27 = vpop.f32.mrb[64].mxu1  ;;  %v3597_v4 = vpop.f32.mrb[65].mxu0 }
 0x255   : > { %v3598_v48 = vadd.f32 %v3597_v4, %v3596_v3  ;;  %v3661_v8 = vpop.f32.mrb[65].mxu1  ;;  %v3599_v10 = vpop.f32.mrb[66].mxu0 }
 0x256   : > { %v3662_v50 = vadd.f32 %v3661_v8, %v3660_v27  ;;  %v3663_v13 = vpop.f32.mrb[66].mxu1  ;;  %v3600_v62 = vpop.f32.mrb[67].mxu0 }
 0x257   : > { %v2330_v40 = vadd.f32 %v3598_v48, %v5238_v55  ;;  %v3601_v14 = vadd.f32 %v3600_v62, %v3599_v10  ;;  %v3664_v0 = vpop.f32.mrb[67].mxu1 }
 0x258   : > { %v3665_v18 = vadd.f32 %v3664_v0, %v3663_v13 }
 0x259   : > { %v5281_v11 = vadd.f32 %v3662_v50, %v2330_v40  ;;  %v2333_v53 = vadd.f32 %v3601_v14, %v5240_v1 }
 0x25b   : > { %v5284_v5 = vadd.f32 %v3665_v18, %v2333_v53  ;;  %v3602_v12 = vpop.f32.mrb[68].mxu0 }
 0x25c   : > { %v3666_v21 = vpop.f32.mrb[68].mxu1  ;;  %v3603_v46 = vpop.f32.mrb[69].mxu0 }
 0x25d   : > { %v3604_v6 = vadd.f32 %v3603_v46, %v3602_v12  ;;  %v3667_v29 = vpop.f32.mrb[69].mxu1  ;;  %v3605_v32 = vpop.f32.mrb[70].mxu0 }
 0x25e   : > { %v3668_v33 = vadd.f32 %v3667_v29, %v3666_v21  ;;  %v3669_v35 = vpop.f32.mrb[70].mxu1  ;;  %v3606_v25 = vpop.f32.mrb[71].mxu0 }
 0x25f   : > { %v2338_v55 = vadd.f32 %v3604_v6, %v5242_v28  ;;  %v3607_v36 = vadd.f32 %v3606_v25, %v3605_v32  ;;  %v3670_v37 = vpop.f32.mrb[71].mxu1 }
 0x260   : > { %v3671_v38 = vadd.f32 %v3670_v37, %v3669_v35 }
 0x261   : > { %v5287_v41 = vadd.f32 %v3668_v33, %v2338_v55  ;;  %v2341_v1 = vadd.f32 %v3607_v36, %v5244_v15 }
 0x263   : > { %v5290_v39 = vadd.f32 %v3671_v38, %v2341_v1  ;;  %v3608_v43 = vpop.f32.mrb[72].mxu0 }
 0x264   : > { %v3672_v44 = vpop.f32.mrb[72].mxu1  ;;  %v3609_v45 = vpop.f32.mrb[73].mxu0 }
 0x265   : > { %v3610_v19 = vadd.f32 %v3609_v45, %v3608_v43  ;;  %v3673_v51 = vpop.f32.mrb[73].mxu1  ;;  %v3611_v52 = vpop.f32.mrb[74].mxu0 }
 0x266   : > { %v3674_v56 = vadd.f32 %v3673_v51, %v3672_v44  ;;  %v3675_v57 = vpop.f32.mrb[74].mxu1  ;;  %v3612_v59 = vpop.f32.mrb[75].mxu0 }
 0x267   : > { %v2346_v28 = vadd.f32 %v3610_v19, %v5246_v34  ;;  %v3613_v42 = vadd.f32 %v3612_v59, %v3611_v52  ;;  %v3676_v26 = vpop.f32.mrb[75].mxu1 }
 0x268   : > { %v3677_v31 = vadd.f32 %v3676_v26, %v3675_v57 }
 0x269   : > { %v5293_v61 = vadd.f32 %v3674_v56, %v2346_v28  ;;  %v2349_v15 = vadd.f32 %v3613_v42, %v5248_v17 }
 0x26b   : > { %v5296_v16 = vadd.f32 %v3677_v31, %v2349_v15  ;;  %v3694_v20 = vpop.f32.mrb[76].mxu0 }
 0x26c   : > { %v3758_v54 = vpop.f32.mrb[76].mxu1  ;;  %v3695_v63 = vpop.f32.mrb[77].mxu0 }
 0x26d   : > { %v3696_v24 = vadd.f32 %v3695_v63, %v3694_v20  ;;  %v3759_v3 = vpop.f32.mrb[77].mxu1  ;;  %v3697_v27 = vpop.f32.mrb[78].mxu0 }
 0x26e   : > { %v3760_v4 = vadd.f32 %v3759_v3, %v3758_v54  ;;  %v3761_v48 = vpop.f32.mrb[78].mxu1  ;;  %v3698_v8 = vpop.f32.mrb[79].mxu0 }
 0x26f   : > { %v2484_v34 = vadd.f32 %v3696_v24, %v5251_v58  ;;  %v3699_v10 = vadd.f32 %v3698_v8, %v3697_v27  ;;  %v3762_v50 = vpop.f32.mrb[79].mxu1 }
 0x270   : > { %v3763_v13 = vadd.f32 %v3762_v50, %v3761_v48 }
 0x271   : > { %v5299_v62 = vadd.f32 %v3760_v4, %v2484_v34  ;;  %v2487_v17 = vadd.f32 %v3699_v10, %v5254_v30 }
 0x273   : > { %v5302_v40 = vadd.f32 %v3763_v13, %v2487_v17  ;;  %v3700_v14 = vpop.f32.mrb[80].mxu0  ;;  %v2644_v0 = vsel %vm2643_vm1, %v5299_v62, 0.0 }
 0x274   : > { %v3764_v18 = vpop.f32.mrb[80].mxu1  ;;  %v3701_v53 = vpop.f32.mrb[81].mxu0  ;;  %2645 = vadd.xlane.f32.xlu0 %v2644_v0 }
 0x275   : > { %v3702_v12 = vadd.f32 %v3701_v53, %v3700_v14  ;;  %v3765_v21 = vpop.f32.mrb[81].mxu1  ;;  %v3703_v58 = vpop.f32.mrb[82].mxu0  ;;  %v2647_v30 = vsel %vm2643_vm1, %v5302_v40, 0.0 }
 0x276   : > { %v3766_v46 = vadd.f32 %v3765_v21, %v3764_v18  ;;  %v3767_v6 = vpop.f32.mrb[82].mxu1  ;;  %v3704_v29 = vpop.f32.mrb[83].mxu0 }
 0x277   : > { %v2492_v32 = vadd.f32 %v3702_v12, %v5257_v9  ;;  %v3705_v33 = vadd.f32 %v3704_v29, %v3703_v58  ;;  %v3768_v35 = vpop.f32.mrb[83].mxu1 }
 0x278   : > { %v3769_v25 = vadd.f32 %v3768_v35, %v3767_v6  ;;  %2648 = vadd.xlane.f32.xlu0 %v2647_v30 }
 0x279   : > { %v5309_v55 = vadd.f32 %v3766_v46, %v2492_v32  ;;  %v2495_v36 = vadd.f32 %v3705_v33, %v5260_v7 }
 0x27b   : > { %v5312_v37 = vadd.f32 %v3769_v25, %v2495_v36  ;;  %v3706_v38 = vpop.f32.mrb[84].mxu0  ;;  %v2650_v1 = vsel %vm2643_vm1, %v5309_v55, 0.0 }
 0x27c   : > { %v3770_v43 = vpop.f32.mrb[84].mxu1  ;;  %v3707_v44 = vpop.f32.mrb[85].mxu0  ;;  %2651 = vadd.xlane.f32.xlu1 %v2650_v1 }
 0x27d   : > { %v3708_v9 = vadd.f32 %v3707_v44, %v3706_v38  ;;  %v3771_v45 = vpop.f32.mrb[85].mxu1  ;;  %v3709_v19 = vpop.f32.mrb[86].mxu0  ;;  %v2653_v7 = vsel %vm2643_vm1, %v5312_v37, 0.0 }
 0x27e   : > { %v3772_v51 = vadd.f32 %v3771_v45, %v3770_v43  ;;  %v3773_v52 = vpop.f32.mrb[86].mxu1  ;;  %v3710_v56 = vpop.f32.mrb[87].mxu0 }
 0x27f   : > { %v2500_v57 = vadd.f32 %v3708_v9, %v5263_v22  ;;  %v3711_v59 = vadd.f32 %v3710_v56, %v3709_v19  ;;  %v3774_v28 = vpop.f32.mrb[87].mxu1 }
 0x280   : > { %v3775_v42 = vadd.f32 %v3774_v28, %v3773_v52  ;;  %2654 = vadd.xlane.f32.xlu1 %v2653_v7 }
 0x281   : > { %v5319_v26 = vadd.f32 %v3772_v51, %v2500_v57  ;;  %v2503_v31 = vadd.f32 %v3711_v59, %v5266_v23 }
 0x283   : > { %v5322_v15 = vadd.f32 %v3775_v42, %v2503_v31  ;;  %v3712_v20 = vpop.f32.mrb[88].mxu0  ;;  %v2656_v54 = vsel %vm2643_vm1, %v5319_v26, 0.0 }
 0x284   : > { %v3776_v63 = vpop.f32.mrb[88].mxu1  ;;  %v3713_v24 = vpop.f32.mrb[89].mxu0  ;;  %2657 = vadd.xlane.f32.xlu0 %v2656_v54 }
 0x285   : > { %v3714_v22 = vadd.f32 %v3713_v24, %v3712_v20  ;;  %v3777_v3 = vpop.f32.mrb[89].mxu1  ;;  %v3715_v27 = vpop.f32.mrb[90].mxu0  ;;  %v2659_v4 = vsel %vm2643_vm1, %v5322_v15, 0.0 }
 0x286   : > { %v3778_v48 = vadd.f32 %v3777_v3, %v3776_v63  ;;  %v3779_v8 = vpop.f32.mrb[90].mxu1  ;;  %v3716_v34 = vpop.f32.mrb[91].mxu0  ;;  %2660 = vadd.xlane.f32.xlu1 %v2659_v4 }
 0x287   : > { %v2508_v23 = vadd.f32 %v3714_v22, %v5269_v47  ;;  %v3717_v10 = vadd.f32 %v3716_v34, %v3715_v27  ;;  %v3780_v50 = vpop.f32.mrb[91].mxu1 }
 0x288   : > { %v3781_v13 = vadd.f32 %v3780_v50, %v3779_v8 }
 0x289   : > { %v5329_v17 = vadd.f32 %v3778_v48, %v2508_v23  ;;  %v2511_v14 = vadd.f32 %v3717_v10, %v5272_v49 }
 0x28b   : > { %v5332_v0 = vadd.f32 %v3781_v13, %v2511_v14  ;;  %v3718_v18 = vpop.f32.mrb[92].mxu0  ;;  %v2662_v53 = vsel %vm2643_vm1, %v5329_v17, 0.0 }
 0x28c   : > { %v3782_v12 = vpop.f32.mrb[92].mxu1  ;;  %v3719_v21 = vpop.f32.mrb[93].mxu0  ;;  %2663 = vadd.xlane.f32.xlu0 %v2662_v53 }
 0x28d   : > { %v3720_v58 = vadd.f32 %v3719_v21, %v3718_v18  ;;  %v3783_v46 = vpop.f32.mrb[93].mxu1  ;;  %v3721_v6 = vpop.f32.mrb[94].mxu0  ;;  %v2665_v47 = vsel %vm2643_vm1, %v5332_v0, 0.0 }
 0x28e   : > { %v3784_v29 = vadd.f32 %v3783_v46, %v3782_v12  ;;  %v3785_v32 = vpop.f32.mrb[94].mxu1  ;;  %v3722_v33 = vpop.f32.mrb[95].mxu0  ;;  %2666 = vadd.xlane.f32.xlu1 %v2665_v47 }
 0x28f   : > { %v2516_v49 = vadd.f32 %v3720_v58, %v5275_v2  ;;  %v3723_v35 = vadd.f32 %v3722_v33, %v3721_v6  ;;  %v3786_v30 = vpop.f32.mrb[95].mxu1 }
 0x290   : > { %v3787_v25 = vadd.f32 %v3786_v30, %v3785_v32 }
 0x291   : > { %v5339_v36 = vadd.f32 %v3784_v29, %v2516_v49  ;;  %v2519_v38 = vadd.f32 %v3723_v35, %v5278_v60 }
 0x293   : > { %v5342_v1 = vadd.f32 %v3787_v25, %v2519_v38  ;;  %v3724_v43 = vpop.f32.mrb[96].mxu0  ;;  %v2668_v44 = vsel %vm2643_vm1, %v5339_v36, 0.0 }
 0x294   : > { %v3788_v9 = vpop.f32.mrb[96].mxu1  ;;  %v3725_v45 = vpop.f32.mrb[97].mxu0  ;;  %2669 = vadd.xlane.f32.xlu0 %v2668_v44 }
 0x295   : > { %v3726_v19 = vadd.f32 %v3725_v45, %v3724_v43  ;;  %v3789_v51 = vpop.f32.mrb[97].mxu1  ;;  %v3727_v52 = vpop.f32.mrb[98].mxu0  ;;  %v2671_v2 = vsel %vm2643_vm1, %v5342_v1, 0.0 }
 0x296   : > { %v3790_v56 = vadd.f32 %v3789_v51, %v3788_v9  ;;  %v3791_v57 = vpop.f32.mrb[98].mxu1  ;;  %v3728_v59 = vpop.f32.mrb[99].mxu0  ;;  %2672 = vadd.xlane.f32.xlu1 %v2671_v2 }
 0x297   : > { %v2524_v60 = vadd.f32 %v3726_v19, %v5281_v11  ;;  %v3729_v28 = vadd.f32 %v3728_v59, %v3727_v52  ;;  %v3792_v7 = vpop.f32.mrb[99].mxu1 }
 0x298   : > { %v3793_v42 = vadd.f32 %v3792_v7, %v3791_v57 }
 0x299   : > { %v5349_v31 = vadd.f32 %v3790_v56, %v2524_v60  ;;  %v2527_v20 = vadd.f32 %v3729_v28, %v5284_v5 }
 0x29b   : > { %v5352_v54 = vadd.f32 %v3793_v42, %v2527_v20  ;;  %v3730_v63 = vpop.f32.mrb[100].mxu0  ;;  %v2674_v24 = vsel %vm2643_vm1, %v5349_v31, 0.0 }
 0x29c   : > { %v3794_v22 = vpop.f32.mrb[100].mxu1  ;;  %v3731_v3 = vpop.f32.mrb[101].mxu0  ;;  %2675 = vadd.xlane.f32.xlu0 %v2674_v24 }
 0x29d   : > { %v3732_v27 = vadd.f32 %v3731_v3, %v3730_v63  ;;  %v3795_v4 = vpop.f32.mrb[101].mxu1  ;;  %v3733_v48 = vpop.f32.mrb[102].mxu0  ;;  %v2677_v11 = vsel %vm2643_vm1, %v5352_v54, 0.0 }
 0x29e   : > { %v3796_v8 = vadd.f32 %v3795_v4, %v3794_v22  ;;  %v3797_v34 = vpop.f32.mrb[102].mxu1  ;;  %v3734_v23 = vpop.f32.mrb[103].mxu0  ;;  %2678 = vadd.xlane.f32.xlu1 %v2677_v11 }
 0x29f   : > { %v2532_v5 = vadd.f32 %v3732_v27, %v5287_v41  ;;  %v3735_v10 = vadd.f32 %v3734_v23, %v3733_v48  ;;  %v3798_v50 = vpop.f32.mrb[103].mxu1 }
 0x2a0   : > { %v3799_v13 = vadd.f32 %v3798_v50, %v3797_v34 }
 0x2a1   : > { %v5359_v14 = vadd.f32 %v3796_v8, %v2532_v5  ;;  %v2535_v18 = vadd.f32 %v3735_v10, %v5290_v39 }
 0x2a3   : > { %v5362_v53 = vadd.f32 %v3799_v13, %v2535_v18  ;;  %v3736_v12 = vpop.f32.mrb[104].mxu0  ;;  %v2680_v21 = vsel %vm2643_vm1, %v5359_v14, 0.0 }
 0x2a4   : > { %v3800_v58 = vpop.f32.mrb[104].mxu1  ;;  %v3737_v46 = vpop.f32.mrb[105].mxu0  ;;  %2681 = vadd.xlane.f32.xlu0 %v2680_v21 }
 0x2a5   : > { %v3738_v6 = vadd.f32 %v3737_v46, %v3736_v12  ;;  %v3801_v47 = vpop.f32.mrb[105].mxu1  ;;  %v3739_v29 = vpop.f32.mrb[106].mxu0  ;;  %v2683_v41 = vsel %vm2643_vm1, %v5362_v53, 0.0 }
 0x2a6   : > { %v3802_v32 = vadd.f32 %v3801_v47, %v3800_v58  ;;  %v3803_v33 = vpop.f32.mrb[106].mxu1  ;;  %v3740_v49 = vpop.f32.mrb[107].mxu0  ;;  %2684 = vadd.xlane.f32.xlu1 %v2683_v41 }
 0x2a7   : > { %v2540_v39 = vadd.f32 %v3738_v6, %v5293_v61  ;;  %v3741_v35 = vadd.f32 %v3740_v49, %v3739_v29  ;;  %v3804_v30 = vpop.f32.mrb[107].mxu1 }
 0x2a8   : > { %v3805_v25 = vadd.f32 %v3804_v30, %v3803_v33 }
 0x2a9   : > { %v5369_v38 = vadd.f32 %v3802_v32, %v2540_v39  ;;  %v2543_v43 = vadd.f32 %v3741_v35, %v5296_v16 }
 0x2ab   : > { %v5372_v44 = vadd.f32 %v3805_v25, %v2543_v43  ;;  %v2686_v9 = vsel %vm2643_vm1, %v5369_v38, 0.0 }
 0x2ac   : > { %2687 = vadd.xlane.f32.xlu0 %v2686_v9 }
 0x2ad   : > { %v2689_v45 = vsel %vm2643_vm1, %v5372_v44, 0.0 }
 0x2ae   : > { %2690 = vadd.xlane.f32.xlu1 %v2689_v45 }
 0x301   : > { %v2646_v19 = vpop.xlane.xlu0 %2645 }
 0x302   : > { %v5378_v51 = vmul.f32 0.020408163, %v2646_v19 }
 0x304   : > { %v2709_v61 = vsub.f32 %v5299_v62, %v5378_v51 }
 0x305   : > { %v2649_v52 = vpop.xlane.xlu0 %2648 }
 0x306   : > { %v5382_v2 = vmul.f32 0.020408163, %v2649_v52  ;;  %v2725_v16 = vmul.f32 %v2709_v61, %v2709_v61 }
 0x308   : > { %v2710_v56 = vsub.f32 %v5302_v40, %v5382_v2  ;;  %v2741_v57 = vsel %vm2643_vm1, %v2725_v16, 0.0 }
 0x309   : > { %v2652_v59 = vpop.xlane.xlu1 %2651  ;;  %2742 = vadd.xlane.f32.xlu0 %v2741_v57 }
 0x30a   : > { %v5387_v60 = vmul.f32 0.020408163, %v2652_v59  ;;  %v2726_v28 = vmul.f32 %v2710_v56, %v2710_v56 }
 0x30c   : > { %v2711_v7 = vsub.f32 %v5309_v55, %v5387_v60  ;;  %v2744_v42 = vsel %vm2643_vm1, %v2726_v28, 0.0 }
 0x30d   : > { %v2655_v20 = vpop.xlane.xlu1 %2654  ;;  %2745 = vadd.xlane.f32.xlu1 %v2744_v42 }
 0x30e   : > { %v5392_v63 = vmul.f32 0.020408163, %v2655_v20  ;;  %v2727_v24 = vmul.f32 %v2711_v7, %v2711_v7 }
 0x310   : > { %v2712_v22 = vsub.f32 %v5312_v37, %v5392_v63  ;;  %v2747_v3 = vsel %vm2643_vm1, %v2727_v24, 0.0 }
 0x311   : > { %2748 = vadd.xlane.f32.xlu0 %v2747_v3  ;;  %v2658_v27 = vpop.xlane.xlu0 %2657 }
 0x312   : > { %v5397_v4 = vmul.f32 0.020408163, %v2658_v27  ;;  %v2728_v48 = vmul.f32 %v2712_v22, %v2712_v22 }
 0x313   : > { %v2661_v11 = vpop.xlane.xlu1 %2660 }
 0x314   : > { %v2713_v8 = vsub.f32 %v5319_v26, %v5397_v4  ;;  %v5401_v34 = vmul.f32 0.020408163, %v2661_v11  ;;  %v2750_v23 = vsel %vm2643_vm1, %v2728_v48, 0.0 }
 0x315   : > { %2751 = vadd.xlane.f32.xlu1 %v2750_v23 }
 0x316   : > { %v2714_v5 = vsub.f32 %v5322_v15, %v5401_v34  ;;  %v2729_v10 = vmul.f32 %v2713_v8, %v2713_v8 }
 0x318   : > { %v2753_v50 = vsel %vm2643_vm1, %v2729_v10, 0.0  ;;  %v2730_v13 = vmul.f32 %v2714_v5, %v2714_v5 }
 0x319   : > { %2754 = vadd.xlane.f32.xlu0 %v2753_v50  ;;  %v2664_v18 = vpop.xlane.xlu0 %2663 }
 0x31a   : > { %v5407_v12 = vmul.f32 0.020408163, %v2664_v18  ;;  %v2756_v21 = vsel %vm2643_vm1, %v2730_v13, 0.0 }
 0x31b   : > { %v2667_v58 = vpop.xlane.xlu1 %2666  ;;  %2757 = vadd.xlane.f32.xlu1 %v2756_v21 }
 0x31c   : > { %v2715_v46 = vsub.f32 %v5329_v17, %v5407_v12  ;;  %v5412_v6 = vmul.f32 0.020408163, %v2667_v58 }
 0x31e   : > { %v2716_v47 = vsub.f32 %v5332_v0, %v5412_v6  ;;  %v2731_v29 = vmul.f32 %v2715_v46, %v2715_v46 }
 0x320   : > { %v2759_v41 = vsel %vm2643_vm1, %v2731_v29, 0.0  ;;  %v2732_v32 = vmul.f32 %v2716_v47, %v2716_v47 }
 0x321   : > { %2760 = vadd.xlane.f32.xlu0 %v2759_v41  ;;  %v2670_v33 = vpop.xlane.xlu0 %2669 }
 0x322   : > { %v5417_v49 = vmul.f32 0.020408163, %v2670_v33  ;;  %v2762_v39 = vsel %vm2643_vm1, %v2732_v32, 0.0 }
 0x323   : > { %v2673_v35 = vpop.xlane.xlu1 %2672  ;;  %2763 = vadd.xlane.f32.xlu1 %v2762_v39 }
 0x324   : > { %v2717_v30 = vsub.f32 %v5339_v36, %v5417_v49  ;;  %v5422_v25 = vmul.f32 0.020408163, %v2673_v35 }
 0x326   : > { %v2718_v43 = vsub.f32 %v5342_v1, %v5422_v25  ;;  %v2733_v9 = vmul.f32 %v2717_v30, %v2717_v30 }
 0x328   : > { %v2765_v45 = vsel %vm2643_vm1, %v2733_v9, 0.0  ;;  %v2734_v19 = vmul.f32 %v2718_v43, %v2718_v43 }
 0x329   : > { %2766 = vadd.xlane.f32.xlu0 %v2765_v45  ;;  %v2676_v61 = vpop.xlane.xlu0 %2675 }
 0x32a   : > { %v5427_v52 = vmul.f32 0.020408163, %v2676_v61  ;;  %v2768_v16 = vsel %vm2643_vm1, %v2734_v19, 0.0 }
 0x32b   : > { %v2679_v56 = vpop.xlane.xlu1 %2678  ;;  %2769 = vadd.xlane.f32.xlu1 %v2768_v16 }
 0x32c   : > { %v2719_v57 = vsub.f32 %v5349_v31, %v5427_v52  ;;  %v5432_v59 = vmul.f32 0.020408163, %v2679_v56 }
 0x32e   : > { %v2720_v28 = vsub.f32 %v5352_v54, %v5432_v59  ;;  %v2735_v7 = vmul.f32 %v2719_v57, %v2719_v57 }
 0x330   : > { %v2771_v42 = vsel %vm2643_vm1, %v2735_v7, 0.0  ;;  %v2736_v20 = vmul.f32 %v2720_v28, %v2720_v28  ;;  %v5467_v28 = vld [vmem:[%s5464_s18] sm:$0xff] }
 0x331   : > { %2772 = vadd.xlane.f32.xlu0 %v2771_v42  ;;  %v2682_v24 = vpop.xlane.xlu0 %2681 }
 0x332   : > { %v5437_v22 = vmul.f32 0.020408163, %v2682_v24  ;;  %v2774_v3 = vsel %vm2643_vm1, %v2736_v20, 0.0 }
 0x333   : > { %v2685_v27 = vpop.xlane.xlu1 %2684  ;;  %2775 = vadd.xlane.f32.xlu1 %v2774_v3 }
 0x334   : > { %v2721_v48 = vsub.f32 %v5359_v14, %v5437_v22  ;;  %v5442_v11 = vmul.f32 0.020408163, %v2685_v27  ;;  %v5471_v27 = vld [vmem:[%s5464_s18 + $0x8] sm:$0xff] }
 0x336   : > { %v2722_v8 = vsub.f32 %v5362_v53, %v5442_v11  ;;  %v2737_v23 = vmul.f32 %v2721_v48, %v2721_v48 }
 0x338   : > { %v2777_v5 = vsel %vm2643_vm1, %v2737_v23, 0.0  ;;  %v2738_v10 = vmul.f32 %v2722_v8, %v2722_v8 }
 0x339   : > { %2778 = vadd.xlane.f32.xlu0 %v2777_v5  ;;  %v2688_v50 = vpop.xlane.xlu0 %2687 }
 0x33a   : > { %v5447_v13 = vmul.f32 0.020408163, %v2688_v50  ;;  %v2780_v18 = vsel %vm2643_vm1, %v2738_v10, 0.0 }
 0x33b   : > { %v2691_v21 = vpop.xlane.xlu1 %2690  ;;  %2781 = vadd.xlane.f32.xlu1 %v2780_v18 }
 0x33c   : > { %v2723_v58 = vsub.f32 %v5369_v38, %v5447_v13  ;;  %v5452_v46 = vmul.f32 0.020408163, %v2691_v21 }
 0x33e   : > { %v2724_v47 = vsub.f32 %v5372_v44, %v5452_v46  ;;  %v2739_v29 = vmul.f32 %v2723_v58, %v2723_v58 }
 0x340   : > { %v2783_v41 = vsel %vm2643_vm1, %v2739_v29, 0.0  ;;  %v2740_v32 = vmul.f32 %v2724_v47, %v2724_v47 }
 0x341   : > { %2784 = vadd.xlane.f32.xlu0 %v2783_v41  ;;  %v5478_v41 = vld [vmem:[%s5464_s18 + $0x10] sm:$0xff] }
 0x342   : > { %v2786_v33 = vsel %vm2643_vm1, %v2740_v32, 0.0 }
 0x343   : > { %2787 = vadd.xlane.f32.xlu1 %v2786_v33 }
 0x396   : > { %v2743_v39 = vpop.xlane.xlu0 %2742 }
 0x397   : > { %v2789_v35 = vmul.f32 0.020408163, %v2743_v39 }
 0x399   : > { %v2805_v30 = vadd.f32 0.001, %v2789_v35 }
 0x39a   : > { %v2746_v43 = vpop.xlane.xlu1 %2745 }
 0x39b   : > { %3942 = vrsqrt.f32 %v2805_v30  ;;  %v2790_v9 = vmul.f32 0.020408163, %v2746_v43  ;;  %v5483_v43 = vld [vmem:[%s5464_s18 + $0x20] sm:$0xff] }
 0x39d   : > { %v2806_v45 = vadd.f32 0.001, %v2790_v9  ;;  %v5486_v9 = vld [vmem:[%s5464_s18 + $0x18] sm:$0xff] }
 0x39e   : > { %v2749_v19 = vpop.xlane.xlu0 %2748 }
 0x39f   : > { %3944 = vrsqrt.f32 %v2806_v45  ;;  %v2791_v61 = vmul.f32 0.020408163, %v2749_v19 }
 0x3a1   : > { %v2807_v16 = vadd.f32 0.001, %v2791_v61 }
 0x3a2   : > { %v2752_v56 = vpop.xlane.xlu1 %2751 }
 0x3a3   : > { %v2792_v57 = vmul.f32 0.020408163, %v2752_v56  ;;  %3946 = vrsqrt.f32 %v2807_v16 }
 0x3a5   : > { %v3943_v7 = vpop.eup %3942  ;;  %v2808_v42 = vadd.f32 0.001, %v2792_v57 }
 0x3a6   : > { %v2755_v20 = vpop.xlane.xlu0 %2754  ;;  %v2853_v24 = vmul.f32 %v3943_v7, %v5467_v28  ;;  %v5496_v7 = vld [vmem:[%s5464_s18 + $0x28] sm:$0xff] }
 0x3a7   : > { %v2793_v3 = vmul.f32 0.020408163, %v2755_v20  ;;  %3948 = vrsqrt.f32 %v2808_v42 }
 0x3a8   : > { %v2758_v48 = vpop.xlane.xlu1 %2757  ;;  %2967 = vperm.xlu0 %3818, %v2853_v24   ;;  %v2869_v50 = vmul.f32 %v2853_v24, %v5378_v51 }
 0x3a9   : > { %v3945_v8 = vpop.eup %3944  ;;  %v2809_v23 = vadd.f32 0.001, %v2793_v3  ;;  %v2794_v5 = vmul.f32 0.020408163, %v2758_v48 }
 0x3aa   : > { %v2854_v10 = vmul.f32 %v3945_v8, %v5471_v27 }
 0x3ab   : > { %3950 = vrsqrt.f32 %v2809_v23  ;;  %v2810_v18 = vadd.f32 0.001, %v2794_v5  ;;  %v5508_v23 = vld [vmem:[%s5464_s18 + $0x30] sm:$0xff] }
 0x3ac   : > { %2972 = vperm.xlu1 %3819, %v2854_v10   ;;  %2901 = vrot.lane.b32.xlu0 %v2869_v50, %s3983_s19  ;;  %v2870_v58 = vmul.f32 %v2854_v10, %v5382_v2  ;;  %v5512_v10 = vld [vmem:[%s5464_s18 + $0x38] sm:$0xff] }
 0x3ad   : > { %3952 = vrsqrt.f32 %v2810_v18  ;;  %v3947_v47 = vpop.eup %3946 }
 0x3ae   : > { %v2761_v21 = vpop.xlane.xlu0 %2760  ;;  %v2855_v39 = vmul.f32 %v3947_v47, %v5478_v41 }
 0x3af   : > { %v2795_v29 = vmul.f32 0.020408163, %v2761_v21 }
 0x3b0   : > { %2903 = vrot.lane.b32.xlu1 %v2870_v58, %s3983_s19  ;;  %v2764_v32 = vpop.xlane.xlu1 %2763  ;;  %v2871_v19 = vmul.f32 %v2855_v39, %v5387_v60 }
 0x3b1   : > { %v2811_v51 = vadd.f32 0.001, %v2795_v29  ;;  %v2796_v33 = vmul.f32 0.020408163, %v2764_v32  ;;  %v3949_v35 = vpop.eup %3948 }
 0x3b2   : > { %v5493_v16 = vmul.f32 %v3949_v35, %v5486_v9 }
 0x3b3   : > { %3954 = vrsqrt.f32 %v2811_v51  ;;  %v2812_v30 = vadd.f32 0.001, %v2796_v33 }
 0x3b4   : > { %2977 = vperm.xlu1 %3819, %v2855_v39   ;;  %v2872_v3 = vmul.f32 %v5493_v16, %v5392_v63  ;;  %v5529_v39 = vld [vmem:[%s5464_s18 + $0x40] sm:$0xff] }
 0x3b5   : > { %v3951_v2 = vpop.eup %3950  ;;  %3956 = vrsqrt.f32 %v2812_v30 }
 0x3b6   : > { %v2767_v45 = vpop.xlane.xlu0 %2766  ;;  %v5490_v61 = vmul.f32 %v3951_v2, %v5483_v43 }
 0x3b7   : > { %v3953_v56 = vpop.eup %3952  ;;  %v2797_v57 = vmul.f32 0.020408163, %v2767_v45 }
 0x3b8   : > { %v2770_v42 = vpop.xlane.xlu1 %2769  ;;  %2905 = vrot.lane.b32.xlu1 %v2871_v19, %s3983_s19  ;;  %v2873_v20 = vmul.f32 %v5490_v61, %v5397_v4  ;;  %v5505_v48 = vmul.f32 %v3953_v56, %v5496_v7 }
 0x3b9   : > { %v2813_v24 = vadd.f32 0.001, %v2797_v57  ;;  %v2798_v60 = vmul.f32 0.020408163, %v2770_v42 }
 0x3ba   : > { %2909 = vrot.lane.b32.xlu0 %v2873_v20, %s3983_s19  ;;  %v2874_v50 = vmul.f32 %v5505_v48, %v5401_v34 }
 0x3bb   : > { %3958 = vrsqrt.f32 %v2813_v24  ;;  %v2814_v8 = vadd.f32 0.001, %v2798_v60 }
 0x3bc   : > { %2907 = vrot.lane.b32.xlu1 %v2872_v3, %s3983_s19  ;;  %v5541_v3 = vld [vmem:[%s5464_s18 + $0x50] sm:$0xff] }
 0x3bd   : > { %v3955_v5 = vpop.eup %3954  ;;  %3960 = vrsqrt.f32 %v2814_v8 }
 0x3be   : > { %v2773_v4 = vpop.xlane.xlu0 %2772  ;;  %v5517_v63 = vmul.f32 %v3955_v5, %v5508_v23  ;;  %v5545_v5 = vld [vmem:[%s5464_s18 + $0x58] sm:$0xff] }
 0x3bf   : > { %v3957_v18 = vpop.eup %3956  ;;  %v2799_v21 = vmul.f32 0.020408163, %v2773_v4 }
 0x3c0   : > { %v2776_v58 = vpop.xlane.xlu1 %2775  ;;  %2911 = vrot.lane.b32.xlu1 %v2874_v50, %s3983_s19  ;;  %v2875_v47 = vmul.f32 %v5517_v63, %v5407_v12  ;;  %v5523_v29 = vmul.f32 %v3957_v18, %v5512_v10  ;;  %v5533_v12 = vld [vmem:[%s5464_s18 + $0x48] sm:$0xff] }
 0x3c1   : > { %v2815_v32 = vadd.f32 0.001, %v2799_v21  ;;  %v2800_v51 = vmul.f32 0.020408163, %v2776_v58 }
 0x3c2   : > { %2913 = vrot.lane.b32.xlu0 %v2875_v47, %s3983_s19  ;;  %v2876_v34 = vmul.f32 %v5523_v29, %v5412_v6 }
 0x3c3   : > { %3962 = vrsqrt.f32 %v2815_v32  ;;  %v2816_v33 = vadd.f32 0.001, %v2800_v51 }
 0x3c4   : > { %2915 = vrot.lane.b32.xlu1 %v2876_v34, %s3983_s19 }
 0x3c5   : > { %v3959_v35 = vpop.eup %3958  ;;  %3964 = vrsqrt.f32 %v2816_v33  ;;  %v5553_v33 = vld [vmem:[%s5464_s18 + $0x60] sm:$0xff] }
 0x3c6   : > { %v2779_v30 = vpop.xlane.xlu0 %2778  ;;  %v2861_v2 = vmul.f32 %v3959_v35, %v5529_v39 }
 0x3c7   : > { %v3961_v45 = vpop.eup %3960  ;;  %v2801_v19 = vmul.f32 0.020408163, %v2779_v30  ;;  %v5557_v30 = vld [vmem:[%s5464_s18 + $0x68] sm:$0xff] }
 0x3c8   : > { %v2782_v56 = vpop.xlane.xlu1 %2781  ;;  %v2877_v6 = vmul.f32 %v2861_v2, %v5417_v49  ;;  %v2862_v57 = vmul.f32 %v3961_v45, %v5533_v12 }
 0x3c9   : > { %v2817_v42 = vadd.f32 0.001, %v2801_v19  ;;  %v2802_v20 = vmul.f32 0.020408163, %v2782_v56 }
 0x3ca   : > { %2917 = vrot.lane.b32.xlu0 %v2877_v6, %s3983_s19  ;;  %v2878_v24 = vmul.f32 %v2862_v57, %v5422_v25  ;;  %v5565_v6 = vld [vmem:[%s5464_s18 + $0x70] sm:$0xff] }
 0x3cb   : > { %3966 = vrsqrt.f32 %v2817_v42  ;;  %v2818_v60 = vadd.f32 0.001, %v2802_v20  ;;  %v5569_v20 = vld [vmem:[%s5464_s18 + $0x78] sm:$0xff] }
 0x3cc   : > { %2919 = vrot.lane.b32.xlu1 %v2878_v24, %s3983_s19 }
 0x3cd   : > { %v3963_v8 = vpop.eup %3962  ;;  %3968 = vrsqrt.f32 %v2818_v60 }
 0x3ce   : > { %v2785_v49 = vpop.xlane.xlu0 %2784  ;;  %v2863_v4 = vmul.f32 %v3963_v8, %v5541_v3 }
 0x3cf   : > { %v3965_v50 = vpop.eup %3964  ;;  %v2803_v18 = vmul.f32 0.020408163, %v2785_v49 }
 0x3d0   : > { %v2788_v21 = vpop.xlane.xlu1 %2787  ;;  %v2879_v25 = vmul.f32 %v2863_v4, %v5427_v52  ;;  %v2864_v58 = vmul.f32 %v3965_v50, %v5545_v5 }
 0x3d1   : > { %v2819_v47 = vadd.f32 0.001, %v2803_v18  ;;  %v2804_v32 = vmul.f32 0.020408163, %v2788_v21 }
 0x3d2   : > { %2921 = vrot.lane.b32.xlu0 %v2879_v25, %s3983_s19  ;;  %v2880_v51 = vmul.f32 %v2864_v58, %v5432_v59 }
 0x3d3   : > { %3970 = vrsqrt.f32 %v2819_v47  ;;  %v2820_v34 = vadd.f32 0.001, %v2804_v32 }
 0x3d4   : > { %2923 = vrot.lane.b32.xlu1 %v2880_v51, %s3983_s19 }
 0x3d5   : > { %v3967_v35 = vpop.eup %3966  ;;  %3972 = vrsqrt.f32 %v2820_v34 }
 0x3d6   : > { %v2865_v52 = vmul.f32 %v3967_v35, %v5553_v33 }
 0x3d7   : > { %v3969_v45 = vpop.eup %3968 }
 0x3d8   : > { %v2881_v19 = vmul.f32 %v2865_v52, %v5437_v22  ;;  %v2866_v56 = vmul.f32 %v3969_v45, %v5557_v30 }
 0x3da   : > { %2925 = vrot.lane.b32.xlu0 %v2881_v19, %s3983_s19  ;;  %v2882_v59 = vmul.f32 %v2866_v56, %v5442_v11  ;;  %v3984_v11 = vmov 1  }
 0x3dc   : > { %2927 = vrot.lane.b32.xlu1 %v2882_v59, %s3983_s19 }
 0x3dd   : > { %v3971_v42 = vpop.eup %3970 }
 0x3de   : > { %v2867_v24 = vmul.f32 %v3971_v42, %v5565_v6 }
 0x3df   : > { %v3973_v60 = vpop.eup %3972 }
 0x3e0   : > { %v2883_v8 = vmul.f32 %v2867_v24, %v5447_v13  ;;  %v2868_v22 = vmul.f32 %v3973_v60, %v5569_v20 }
 0x3e2   : > { %2929 = vrot.lane.b32.xlu0 %v2883_v8, %s3983_s19  ;;  %v2884_v49 = vmul.f32 %v2868_v22, %v5452_v46 }
 0x3e4   : > { %2931 = vrot.lane.b32.xlu1 %v2884_v49, %s3983_s19 }
 0x3e6   : > { %2982 = vperm.xlu0 %3818, %v5493_v16  }
 0x3e8   : > { %2987 = vperm.xlu1 %3819, %v5490_v61  }
 0x3ea   : > { %2992 = vperm.xlu0 %3818, %v5505_v48  }
 0x3ec   : > { %2997 = vperm.xlu1 %3819, %v5517_v63  }
 0x3ee   : > { %3002 = vperm.xlu0 %3818, %v5523_v29  }
 0x3f0   : > { %3007 = vperm.xlu1 %3819, %v2861_v2  }
 0x3f2   : > { %3012 = vperm.xlu0 %3818, %v2862_v57  }
 0x3f4   : > { %3017 = vperm.xlu1 %3819, %v2863_v4  }
 0x3f6   : > { %3022 = vperm.xlu0 %3818, %v2864_v58  }
 0x3f8   : > { %3027 = vperm.xlu1 %3819, %v2865_v52  }
 0x3fa   : > { %3032 = vperm.xlu0 %3818, %v2866_v56  }
 0x3fc   : > { %3037 = vperm.xlu1 %3819, %v2867_v24  }
 0x3fe   : > { %3042 = vperm.xlu0 %3818, %v2868_v22  }
 0x400   : > { %3820 = vset.pattern.permute.xlu1 %v3984_v11 }
 0x402   : > { %3821 = vset.pattern.permute.xlu0 %v3984_v11 }
 0x427   : > { %v5582_v13 = vpop.permute.xlu0 %2967 }
 0x42b   : > { %v5584_v46 = vpop.permute.xlu1 %2972  ;;  %v2902_v61 = vpop.permute.xlu0 %2901 }
 0x42c   : > { %v2949_v16 = vsub.f32 %v5467_v28, %v2902_v61 }
 0x42e   : > { %3063 = vperm.xlu1 %3820, %v2949_v16  }
 0x42f   : > { %v2904_v48 = vpop.permute.xlu1 %2903  ;;  %v2910_v63 = vpop.permute.xlu0 %2909 }
 0x430   : > { %v2950_v29 = vsub.f32 %v5471_v27, %v2904_v48  ;;  %v2953_v57 = vsub.f32 %v5483_v43, %v2910_v63  ;;  %v3046_v63 = vmul.f32 %v5584_v46, %v5302_v40 }
 0x432   : > { %3068 = vperm.xlu0 %3821, %v2950_v29  }
 0x433   : > { %v5588_v2 = vpop.permute.xlu1 %2977 }
 0x434   : > { %v2914_v4 = vpop.permute.xlu0 %2913 }
 0x435   : > { %v2955_v18 = vsub.f32 %v5508_v23, %v2914_v4 }
 0x436   : > { %3083 = vperm.xlu0 %3821, %v2953_v57  }
 0x437   : > { %v2906_v50 = vpop.permute.xlu1 %2905 }
 0x438   : > { %v2951_v21 = vsub.f32 %v5478_v41, %v2906_v50  ;;  %v3047_v50 = vmul.f32 %v5588_v2, %v5309_v55 }
 0x43a   : > { %3073 = vperm.xlu1 %3820, %v2951_v21   ;;  %3093 = vperm.xlu0 %3821, %v2955_v18  }
 0x43b   : > { %v2908_v28 = vpop.permute.xlu1 %2907 }
 0x43c   : > { %v2952_v25 = vsub.f32 %v5486_v9, %v2908_v28  ;;  %v2918_v58 = vpop.permute.xlu0 %2917 }
 0x43d   : > { %v2957_v27 = vsub.f32 %v5529_v39, %v2918_v58 }
 0x43e   : > { %3078 = vperm.xlu1 %3820, %v2952_v25  }
 0x43f   : > { %v2912_v47 = vpop.permute.xlu1 %2911  ;;  %3103 = vperm.xlu0 %3821, %v2957_v27  }
 0x440   : > { %v2954_v43 = vsub.f32 %v5496_v7, %v2912_v47 }
 0x442   : > { %3088 = vperm.xlu1 %3820, %v2954_v43  }
 0x443   : > { %v2916_v32 = vpop.permute.xlu1 %2915 }
 0x444   : > { %v2956_v51 = vsub.f32 %v5512_v10, %v2916_v32  ;;  %v2922_v23 = vpop.permute.xlu0 %2921 }
 0x445   : > { %v2959_v41 = vsub.f32 %v5541_v3, %v2922_v23 }
 0x446   : > { %3098 = vperm.xlu1 %3820, %v2956_v51  }
 0x447   : > { %v2920_v34 = vpop.permute.xlu1 %2919  ;;  %3113 = vperm.xlu0 %3821, %v2959_v41  }
 0x448   : > { %v2958_v9 = vsub.f32 %v5533_v12, %v2920_v34 }
 0x44a   : > { %3108 = vperm.xlu1 %3820, %v2958_v9  }
 0x44b   : > { %v2924_v35 = vpop.permute.xlu1 %2923 }
 0x44c   : > { %v2960_v39 = vsub.f32 %v5545_v5, %v2924_v35  ;;  %v2926_v52 = vpop.permute.xlu0 %2925 }
 0x44d   : > { %v2961_v45 = vsub.f32 %v5553_v33, %v2926_v52 }
 0x44e   : > { %3118 = vperm.xlu1 %3820, %v2960_v39  }
 0x44f   : > { %v2928_v7 = vpop.permute.xlu1 %2927  ;;  %3123 = vperm.xlu0 %3821, %v2961_v45  }
 0x450   : > { %v2962_v10 = vsub.f32 %v5557_v30, %v2928_v7 }
 0x452   : > { %3128 = vperm.xlu1 %3820, %v2962_v10  }
 0x454   : > { %v2930_v19 = vpop.permute.xlu0 %2929 }
 0x455   : > { %v2963_v3 = vsub.f32 %v5565_v6, %v2930_v19  ;;  %v3045_v6 = vmul.f32 %v5582_v13, %v5299_v62 }
 0x456   : > { %v2932_v56 = vpop.permute.xlu1 %2931 }
 0x457   : > { %v2964_v59 = vsub.f32 %v5569_v20, %v2932_v56  ;;  %3133 = vperm.xlu0 %3821, %v2963_v3  }
 0x459   : > { %3138 = vperm.xlu1 %3820, %v2964_v59  }
 0x465   : > { %v2983_v12 = vpop.permute.xlu0 %2982 }
 0x467   : > { %v2988_v5 = vpop.permute.xlu1 %2987 }
 0x468   : > { %v3049_v29 = vmul.f32 %v2988_v5, %v5319_v26  ;;  %v3048_v26 = vmul.f32 %v2983_v12, %v5312_v37 }
 0x469   : > { %v2993_v42 = vpop.permute.xlu0 %2992 }
 0x46a   : > { %v3050_v27 = vmul.f32 %v2993_v42, %v5322_v15 }
 0x46b   : > { %v2998_v24 = vpop.permute.xlu1 %2997 }
 0x46c   : > { %v3051_v18 = vmul.f32 %v2998_v24, %v5329_v17 }
 0x46d   : > { %v3003_v33 = vpop.permute.xlu0 %3002 }
 0x46e   : > { %v3052_v43 = vmul.f32 %v3003_v33, %v5332_v0 }
 0x46f   : > { %v3008_v60 = vpop.permute.xlu1 %3007 }
 0x470   : > { %v3053_v25 = vmul.f32 %v3008_v60, %v5339_v36 }
 0x471   : > { %v3013_v8 = vpop.permute.xlu0 %3012 }
 0x472   : > { %v3054_v15 = vmul.f32 %v3013_v8, %v5342_v1 }
 0x473   : > { %v3018_v22 = vpop.permute.xlu1 %3017 }
 0x474   : > { %v3055_v36 = vmul.f32 %v3018_v22, %v5349_v31 }
 0x475   : > { %v3023_v49 = vpop.permute.xlu0 %3022 }
 0x476   : > { %v3056_v0 = vmul.f32 %v3023_v49, %v5352_v54 }
 0x477   : > { %v3028_v30 = vpop.permute.xlu1 %3027 }
 0x478   : > { %v3057_v31 = vmul.f32 %v3028_v30, %v5359_v14 }
 0x479   : > { %v3033_v11 = vpop.permute.xlu0 %3032 }
 0x47a   : > { %v3058_v1 = vmul.f32 %v3033_v11, %v5362_v53 }
 0x47b   : > { %v3038_v61 = vpop.permute.xlu1 %3037 }
 0x47c   : > { %v3059_v54 = vmul.f32 %v3038_v61, %v5369_v38 }
 0x47d   : > { %v3043_v16 = vpop.permute.xlu0 %3042 }
 0x47e   : > { %v3060_v14 = vmul.f32 %v3043_v16, %v5372_v44 }
 0x4ad   : > { %v3064_v20 = vpop.permute.xlu1 %3063 }
 0x4ae   : > { %v3141_v48 = vadd.f32 %v3064_v20, %v3045_v6 }
 0x4b0   : > { %3157 = vst.msk [vmem:[%s5611_s25] sm:$0xff] %vm2643_vm1, %v3141_v48 }
 0x4b1   : > { %v3069_v62 = vpop.permute.xlu0 %3068 }
 0x4b2   : > { %v3142_v13 = vadd.f32 %v3069_v62, %v3046_v63 }
 0x4b4   : > { %3158 = vst.msk [vmem:[%s5611_s25 + $0x8] sm:$0xff] %vm2643_vm1, %v3142_v13 }
 0x4b5   : > { %v3084_v57 = vpop.permute.xlu0 %3083 }
 0x4b6   : > { %v3145_v4 = vadd.f32 %v3084_v57, %v3049_v29 }
 0x4b8   : > { %3161 = vst.msk [vmem:[%s5611_s25 + $0x20] sm:$0xff] %vm2643_vm1, %v3145_v4 }
 0x4b9   : > { %v3074_v40 = vpop.permute.xlu1 %3073  ;;  %v3094_v46 = vpop.permute.xlu0 %3093 }
 0x4ba   : > { %v3143_v21 = vadd.f32 %v3074_v40, %v3047_v50  ;;  %v3147_v28 = vadd.f32 %v3094_v46, %v3051_v18 }
 0x4bc   : > { %3159 = vst.msk [vmem:[%s5611_s25 + $0x10] sm:$0xff] %vm2643_vm1, %v3143_v21  ;;  %3163 = vst.msk [vmem:[%s5611_s25 + $0x30] sm:$0xff] %vm2643_vm1, %v3147_v28 }
 0x4bd   : > { %v3079_v55 = vpop.permute.xlu1 %3078 }
 0x4be   : > { %v3144_v2 = vadd.f32 %v3079_v55, %v3048_v26  ;;  %v3104_v17 = vpop.permute.xlu0 %3103 }
 0x4bf   : > { %v3149_v58 = vadd.f32 %v3104_v17, %v3053_v25 }
 0x4c0   : > { %3160 = vst.msk [vmem:[%s5611_s25 + $0x18] sm:$0xff] %vm2643_vm1, %v3144_v2 }
 0x4c1   : > { %3165 = vst.msk [vmem:[%s5611_s25 + $0x40] sm:$0xff] %vm2643_vm1, %v3149_v58  ;;  %v3089_v37 = vpop.permute.xlu1 %3088 }
 0x4c2   : > { %v3146_v47 = vadd.f32 %v3089_v37, %v3050_v27 }
 0x4c4   : > { %3162 = vst.msk [vmem:[%s5611_s25 + $0x28] sm:$0xff] %vm2643_vm1, %v3146_v47 }
 0x4c5   : > { %v3099_v32 = vpop.permute.xlu1 %3098 }
 0x4c6   : > { %v3148_v51 = vadd.f32 %v3099_v32, %v3052_v43  ;;  %v3114_v23 = vpop.permute.xlu0 %3113 }
 0x4c7   : > { %v3151_v41 = vadd.f32 %v3114_v23, %v3055_v36 }
 0x4c8   : > { %3164 = vst.msk [vmem:[%s5611_s25 + $0x38] sm:$0xff] %vm2643_vm1, %v3148_v51 }
 0x4c9   : > { %3167 = vst.msk [vmem:[%s5611_s25 + $0x50] sm:$0xff] %vm2643_vm1, %v3151_v41  ;;  %v3109_v34 = vpop.permute.xlu1 %3108 }
 0x4ca   : > { %v3150_v9 = vadd.f32 %v3109_v34, %v3054_v15 }
 0x4cc   : > { %3166 = vst.msk [vmem:[%s5611_s25 + $0x48] sm:$0xff] %vm2643_vm1, %v3150_v9 }
 0x4cd   : > { %v3119_v35 = vpop.permute.xlu1 %3118 }
 0x4ce   : > { %v3152_v39 = vadd.f32 %v3119_v35, %v3056_v0  ;;  %v3124_v52 = vpop.permute.xlu0 %3123 }
 0x4cf   : > { %v3153_v45 = vadd.f32 %v3124_v52, %v3057_v31 }
 0x4d0   : > { %3168 = vst.msk [vmem:[%s5611_s25 + $0x58] sm:$0xff] %vm2643_vm1, %v3152_v39 }
 0x4d1   : > { %3169 = vst.msk [vmem:[%s5611_s25 + $0x60] sm:$0xff] %vm2643_vm1, %v3153_v45  ;;  %v3129_v7 = vpop.permute.xlu1 %3128 }
 0x4d2   : > { %v3154_v10 = vadd.f32 %v3129_v7, %v3058_v1 }
 0x4d4   : > { %3170 = vst.msk [vmem:[%s5611_s25 + $0x68] sm:$0xff] %vm2643_vm1, %v3154_v10 }
 0x4d6   : > { %v3134_v19 = vpop.permute.xlu0 %3133 }
 0x4d7   : > { %v3155_v3 = vadd.f32 %v3134_v19, %v3059_v54 }
 0x4d8   : > { %v3139_v56 = vpop.permute.xlu1 %3138 }
 0x4d9   : > { %3171 = vst.msk [vmem:[%s5611_s25 + $0x70] sm:$0xff] %vm2643_vm1, %v3155_v3  ;;  %v3156_v59 = vadd.f32 %v3139_v56, %v3060_v14 }
 0x4db   : > { %3172 = vst.msk [vmem:[%s5611_s25 + $0x78] sm:$0xff] %vm2643_vm1, %v3156_v59 }
 0x4dc PF: > { %s16_s21 = sadd.s32 1, %s3980_s21  }
 0x4dd   : > { %p13_p4 = scmp.ge.s32.totalorder %s16_s21, 4  }
 0x4df   :  { %15 = sbr.rel (!%p13_p4) target bundleno = 1 (0x1), region = 77 }

</bundles_post_ra>
